<compile_context>
chip_gen: v7x
topology: tpu7x:2x2x1
jax: 0.10.0
libtpu: 0.0.40
codegen_flags: <defaults>
</compile_context>

<pallas_src>
import jax
import jax.numpy as jnp
from jax.experimental import pallas as pl
from jax.experimental.pallas import tpu as pltpu

_LANE = 128
_SUBLANE = 8
_B_TILE_MAX = 128     # fill the MXU M dimension when the batch allows
_T_CHUNK = 32         # timesteps of input projection staged per grid step
_TIME_UNROLL = 8      # modest unroll of the serial recurrence


def _round_up(x, m):
    return ((x + m - 1) // m) * m


def _lstm_fused_kernel(x_ref, len_ref, w_ih_ref, w_hh_ref, b_ref,
                       w_out_ref, b_out_ref, out_ref, xw_sc, h_sc, c_sc):
    """One batch tile x one time chunk of the fused LSTM.

      x_ref     : (Tc, Bt, E)    f32  time-major embedded inputs (this chunk)
      len_ref   : (Bt, 1)        i32  valid lengths
      w_ih_ref  : (E, 4*Hp)      bf16 input->gate weights, gates [i,f,g,o],
                                      each gate block lane-padded to Hp
      w_hh_ref  : (Hp, 4*Hp)     bf16 hidden->gate weights
      b_ref     : (1, 4*Hp)      f32  b_ih + b_hh (zero in padded lanes)
      w_out_ref : (Hp, Cp)       bf16 output projection
      b_out_ref : (1, Cp)        f32  output bias (-1e30 in padded classes)
      out_ref   : (Bt, Cp)       f32  log-probs (written on the last chunk)
      xw_sc     : (Tc, Bt, 4*Hp) f32  staged x @ W_ih for this chunk
      h_sc,c_sc : (Bt, Hp)       f32  recurrent state carried across chunks
    """
    Tc, Bt, E = x_ref.shape
    Hp = w_hh_ref.shape[0]
    tc = pl.program_id(1)

    @pl.when(tc == 0)
    def _():
        h_sc[...] = jnp.zeros_like(h_sc)
        c_sc[...] = jnp.zeros_like(c_sc)

    # (1) Input projection for the whole chunk as one bf16 MXU matmul with f32
    # accumulation.  The reshape merges (Tc, Bt) into sublanes; Bt is a
    # multiple of 8 so it is tile-aligned.
    x2d = x_ref[...].reshape(Tc * Bt, E).astype(jnp.bfloat16)
    xw = jnp.dot(x2d, w_ih_ref[...], preferred_element_type=jnp.float32)
    xw_sc[...] = xw.reshape(Tc, Bt, 4 * Hp)

    w_hh = w_hh_ref[...]                        # bf16 (Hp, 4Hp)
    bias = b_ref[...]                           # f32  (1, 4Hp)
    lens = len_ref[...]                         # i32  (Bt, 1)
    t0 = tc * Tc

    def _sigmoid(x):
        # sigmoid(x) = 0.5*(tanh(x/2)+1): one EUP op instead of exp + divide.
        return 0.5 * (jnp.tanh(0.5 * x) + 1.0)

    # (2) Serial recurrence over this chunk; h/c carried as f32 loop values.
    # TODO(synk): on v7x, hold W_hh stationary with pltpu.matmul_push_rhs /
    # matmul_acc_lhs instead of re-streaming it through the MXU every step.
    def step(t, carry):
        h, c = carry
        gates = (xw_sc[t]
                 + jnp.dot(h.astype(jnp.bfloat16), w_hh,
                           preferred_element_type=jnp.float32)
                 + bias)
        # Gate slices are lane-aligned (each gate block is Hp = k*128 wide).
        i_g = _sigmoid(gates[:, 0 * Hp:1 * Hp])
        f_g = _sigmoid(gates[:, 1 * Hp:2 * Hp])
        g_g = jnp.tanh(gates[:, 2 * Hp:3 * Hp])
        o_g = _sigmoid(gates[:, 3 * Hp:4 * Hp])
        c_new = f_g * c + i_g * g_g
        h_new = o_g * jnp.tanh(c_new)
        # pack_padded_sequence semantics: freeze state once t >= length[b].
        valid = lens > (t0 + t)
        return (jnp.where(valid, h_new, h), jnp.where(valid, c_new, c))

    h_n, c_n = jax.lax.fori_loop(0, Tc, step, (h_sc[...], c_sc[...]),
                                 unroll=min(Tc, _TIME_UNROLL))
    h_sc[...] = h_n
    c_sc[...] = c_n

    # (3) Fused head on the last chunk: linear + log_softmax, lane-dense store.
    @pl.when(tc == pl.num_programs(1) - 1)
    def _():
        logits = (jnp.dot(h_n.astype(jnp.bfloat16), w_out_ref[...],
                          preferred_element_type=jnp.float32)
                  + b_out_ref[...])
        m = jnp.max(logits, axis=-1, keepdims=True)
        shifted = logits - m
        lse = jnp.log(jnp.sum(jnp.exp(shifted), axis=-1, keepdims=True))
        out_ref[...] = shifted - lse


def _pack_gate_cols(w, h, hp, dtype):
    """Re-lay the 4 contiguous gate blocks of width h at stride hp (zero-pad)."""
    rows = w.shape[0]
    out = jnp.zeros((rows, 4 * hp), dtype)
    for k in range(4):
        out = out.at[:, k * hp:k * hp + h].set(
            w[:, k * h:(k + 1) * h].astype(dtype))
    return out


def lstm_forward(inputs, lengths, params):
    """Forward pass matching the PyTorch LSTM module (inputs: (B, T) ids)."""
    B, T = inputs.shape
    E = params["embedding"].shape[1]
    H = params["w_hh_t"].shape[0]
    C = params["w_out_t"].shape[1]

    # --- tiling decisions ---------------------------------------------------
    # Batch tile grows up to 128 rows to fill the MXU M dimension; padded rows
    # get length 0 (state never updates) and are sliced away at the end.
    Bt = min(_B_TILE_MAX, _round_up(B, _SUBLANE))
    B_pad = _round_up(B, Bt)
    # Time is processed in chunks so VMEM use does not scale with T.
    Tc = min(_T_CHUNK, T)
    T_pad = _round_up(T, Tc)
    # Gate blocks / hidden state lane-padded; padded hidden units see zero
    # weights and bias so their c/h stay exactly 0.
    Hp = _round_up(H, _LANE)
    # Classes lane-padded; padded classes get a -1e30 bias so exp() underflows
    # to exactly 0 in the softmax denominator.
    Cp = _round_up(max(C, _LANE), _LANE)

    ids = jnp.pad(inputs.astype(jnp.int32), ((0, B_pad - B), (0, T_pad - T)))
    lens = jnp.pad(lengths.astype(jnp.int32), (0, B_pad - B)).reshape(B_pad, 1)

    # Embedding lookup issued directly in time-major order (no separate
    # (B,T,E)->(T,B,E) HBM transpose pass).
    # TODO(synk): fuse this gather into the kernel (scalar-prefetch ids + DMA
    # row gather from an HBM-resident table) to remove the extra HBM round
    # trip of the (T, B, E) activation.
    x_tm = params["embedding"][ids.T]                      # (T_pad, B_pad, E) f32

    # --- weight packing (bf16 MXU operands, gate blocks lane-padded) ---------
    w_ih_p = _pack_gate_cols(params["w_ih_t"], H, Hp, jnp.bfloat16)     # (E, 4Hp)
    w_hh_rows = jnp.pad(params["w_hh_t"], ((0, Hp - H), (0, 0)))
    w_hh_p = _pack_gate_cols(w_hh_rows, H, Hp, jnp.bfloat16)            # (Hp, 4Hp)
    b_p = _pack_gate_cols(params["b"], H, Hp, jnp.float32)              # (1, 4Hp)
    w_out_p = jnp.zeros((Hp, Cp), jnp.bfloat16).at[:H, :C].set(
        params["w_out_t"].astype(jnp.bfloat16))
    b_out_p = jnp.full((1, Cp), -1e30, jnp.float32).at[:, :C].set(params["b_out"])

    n_btiles = B_pad // Bt
    n_tchunks = T_pad // Tc

    # TODO(synk): single-buffer the constant-index weight BlockSpecs
    # (pipeline_mode=pl.Buffered(1)) to halve their VMEM footprint on v7x.
    out = pl.pallas_call(
        _lstm_fused_kernel,
        out_shape=jax.ShapeDtypeStruct((B_pad, Cp), jnp.float32),
        grid_spec=pltpu.PrefetchScalarGridSpec(
            num_scalar_prefetch=0,
            grid=(n_btiles, n_tchunks),
            in_specs=[
                pl.BlockSpec((Tc, Bt, E), lambda bi, tc: (tc, bi, 0)),   # x chunk
                pl.BlockSpec((Bt, 1), lambda bi, tc: (bi, 0)),           # lengths
                pl.BlockSpec((E, 4 * Hp), lambda bi, tc: (0, 0)),        # W_ih^T
                pl.BlockSpec((Hp, 4 * Hp), lambda bi, tc: (0, 0)),       # W_hh^T
                pl.BlockSpec((1, 4 * Hp), lambda bi, tc: (0, 0)),        # b_ih+b_hh
                pl.BlockSpec((Hp, Cp), lambda bi, tc: (0, 0)),           # W_out^T
                pl.BlockSpec((1, Cp), lambda bi, tc: (0, 0)),            # b_out
            ],
            out_specs=pl.BlockSpec((Bt, Cp), lambda bi, tc: (bi, 0)),
            scratch_shapes=[
                pltpu.VMEM((Tc, Bt, 4 * Hp), jnp.float32),  # staged x @ W_ih
                pltpu.VMEM((Bt, Hp), jnp.float32),          # h across chunks
                pltpu.VMEM((Bt, Hp), jnp.float32),          # c across chunks
            ],
        ),
        compiler_params=pltpu.CompilerParams(
            # Batch tiles are independent (megacore-shardable); time chunks
            # are a serial carried recurrence.
            dimension_semantics=("parallel", "arbitrary"),
            vmem_limit_bytes=48 * 1024 * 1024,   # <= v7x 64 MiB, ample on v5e/v6e
        ),
    )(x_tm, lens, w_ih_p, w_hh_p, b_p, w_out_p, b_out_p)

    return out[:B, :C]


def init_params(key, vocab_size, embedding_dim, hidden_dim, num_class):
    ks = jax.random.split(key, 7)
    s = 0.1
    embedding = jax.random.normal(ks[0], (vocab_size, embedding_dim), jnp.float32) * s
    w_ih = jax.random.normal(ks[1], (4 * hidden_dim, embedding_dim), jnp.float32) * s
    w_hh = jax.random.normal(ks[2], (4 * hidden_dim, hidden_dim), jnp.float32) * s
    b_ih = jax.random.normal(ks[3], (4 * hidden_dim,), jnp.float32) * s
    b_hh = jax.random.normal(ks[4], (4 * hidden_dim,), jnp.float32) * s
    w_out = jax.random.normal(ks[5], (num_class, hidden_dim), jnp.float32) * s
    b_out = jax.random.normal(ks[6], (num_class,), jnp.float32) * s
    return {
        "embedding": embedding,               # (V, E)
        "w_ih_t": w_ih.T,                     # (E, 4H), gate order [i, f, g, o]
        "w_hh_t": w_hh.T,                     # (H, 4H)
        "b": (b_ih + b_hh).reshape(1, 4 * hidden_dim),
        "w_out_t": w_out.T,                   # (H, C)
        "b_out": b_out.reshape(1, num_class),
    }


def _reference_forward(inputs, lengths, params):
    """Pure-JAX f32 reference with identical pack_padded_sequence semantics."""
    emb = params["embedding"][inputs]         # (B, T, E)
    B, T, E = emb.shape
    H = params["w_hh_t"].shape[0]
    h = jnp.zeros((B, H), jnp.float32)
    c = jnp.zeros((B, H), jnp.float32)
    for t in range(T):
        x_t = emb[:, t, :]
        gates = x_t @ params["w_ih_t"] + h @ params["w_hh_t"] + params["b"]
        i_g = jax.nn.sigmoid(gates[:, 0 * H:1 * H])
        f_g = jax.nn.sigmoid(gates[:, 1 * H:2 * H])
        g_g = jnp.tanh(gates[:, 2 * H:3 * H])
        o_g = jax.nn.sigmoid(gates[:, 3 * H:4 * H])
        c_new = f_g * c + i_g * g_g
        h_new = o_g * jnp.tanh(c_new)
        valid = (lengths > t)[:, None]
        h = jnp.where(valid, h_new, h)
        c = jnp.where(valid, c_new, c)
    logits = h @ params["w_out_t"] + params["b_out"]
    return jax.nn.log_softmax(logits, axis=-1)


if __name__ == "__main__":
    vocab_size, embedding_dim, hidden_dim, num_class = 50, 32, 32, 4
    batch, seq = 2, 8

    key = jax.random.PRNGKey(0)
    k_tok, k_params = jax.random.split(key)

    inputs = jax.random.randint(k_tok, (batch, seq), 0, vocab_size, dtype=jnp.int32)
    lengths = jnp.array([seq, 5], dtype=jnp.int32)   # rows frozen past length

    params = init_params(k_params, vocab_size, embedding_dim, hidden_dim, num_class)

    log_probs = lstm_forward(inputs, lengths, params)
    jax.block_until_ready(log_probs)

    ref = _reference_forward(inputs, lengths, params)
    assert log_probs.shape == (batch, num_class)
    # bf16 MXU operands with f32 accumulation: allow a small numeric delta
    # against the pure-f32 reference.
    assert jnp.allclose(log_probs, ref, atol=5e-3, rtol=5e-3), "mismatch vs reference"

    print("KERNEL_OK")
</pallas_src>

<mosaic_0001>
module attributes {stable_mosaic.version = 11 : i64} {
  func.func @_lstm_fused_kernel(%arg0: i32, %arg1: i32, %arg2: memref<8x8x32xf32, #tpu.memory_space<vmem>>, %arg3: memref<8x1xi32, #tpu.memory_space<vmem>>, %arg4: memref<32x512xbf16, #tpu.memory_space<vmem>>, %arg5: memref<128x512xbf16, #tpu.memory_space<vmem>>, %arg6: memref<1x512xf32, #tpu.memory_space<vmem>>, %arg7: memref<128x128xbf16, #tpu.memory_space<vmem>>, %arg8: memref<1x128xf32, #tpu.memory_space<vmem>>, %arg9: memref<8x128xf32, #tpu.memory_space<vmem>>, %arg10: memref<8x8x512xf32, #tpu.memory_space<vmem>>, %arg11: memref<8x128xf32, #tpu.memory_space<vmem>>, %arg12: memref<8x128xf32, #tpu.memory_space<vmem>>) attributes {dimension_semantics = [#tpu.dimension_semantics<parallel>, #tpu.dimension_semantics<arbitrary>], iteration_bounds = array<i64: 1, 1>, scalar_prefetch = 0 : i64, scratch_operands = 3 : i64, tpu.core_type = #tpu.core_type<tc>, window_params = [{transform_indices = @transform_0, window_bounds = array<i64: 8, 8, 32>}, {transform_indices = @transform_1, window_bounds = array<i64: 8, 1>}, {pipeline_mode = #tpu.pipeline_mode<synchronous>, transform_indices = @transform_2, window_bounds = array<i64: 32, 512>}, {pipeline_mode = #tpu.pipeline_mode<synchronous>, transform_indices = @transform_3, window_bounds = array<i64: 128, 512>}, {pipeline_mode = #tpu.pipeline_mode<synchronous>, transform_indices = @transform_4, window_bounds = array<i64: 1, 512>}, {pipeline_mode = #tpu.pipeline_mode<synchronous>, transform_indices = @transform_5, window_bounds = array<i64: 128, 128>}, {pipeline_mode = #tpu.pipeline_mode<synchronous>, transform_indices = @transform_6, window_bounds = array<i64: 1, 128>}, {transform_indices = @transform_7, window_bounds = array<i64: 8, 128>}]} {
    %c0_i32 = arith.constant 0 : i32
    %0 = arith.cmpi eq, %arg1, %c0_i32 : i32
    %1 = arith.extui %0 : i1 to i32
    %c0_i32_0 = arith.constant 0 : i32
    %2 = arith.cmpi ne, %1, %c0_i32_0 : i32
    scf.if %2 {
      %cst_122 = arith.constant 0.000000e+00 : f32
      %405 = vector.broadcast %cst_122 : f32 to vector<8x128xf32>
      %c0_123 = arith.constant 0 : index
      %c0_124 = arith.constant 0 : index
      %406 = vector.load %arg11[%c0_123, %c0_124] : memref<8x128xf32, #tpu.memory_space<vmem>>, vector<8x128xf32>
      tpu.vector_store %arg11[%c0_123, %c0_124], %405 {strides = array<i32>} : memref<8x128xf32, #tpu.memory_space<vmem>>, vector<8x128xf32>,
      %cst_125 = arith.constant 0.000000e+00 : f32
      %407 = vector.broadcast %cst_125 : f32 to vector<8x128xf32>
      %c0_126 = arith.constant 0 : index
      %c0_127 = arith.constant 0 : index
      %408 = vector.load %arg12[%c0_126, %c0_127] : memref<8x128xf32, #tpu.memory_space<vmem>>, vector<8x128xf32>
      tpu.vector_store %arg12[%c0_126, %c0_127], %407 {strides = array<i32>} : memref<8x128xf32, #tpu.memory_space<vmem>>, vector<8x128xf32>,
    } else {
    }
    %c0 = arith.constant 0 : index
    %c0_1 = arith.constant 0 : index
    %c0_2 = arith.constant 0 : index
    %3 = vector.load %arg2[%c0, %c0_1, %c0_2] : memref<8x8x32xf32, #tpu.memory_space<vmem>>, vector<8x8x32xf32>
    %4 = vector.shape_cast %3 : vector<8x8x32xf32> to vector<64x32xf32>
    %5 = arith.truncf %4 : vector<64x32xf32> to vector<64x32xbf16>
    %c0_3 = arith.constant 0 : index
    %c0_4 = arith.constant 0 : index
    %6 = vector.load %arg4[%c0_3, %c0_4] : memref<32x512xbf16, #tpu.memory_space<vmem>>, vector<32x512xbf16>
    %cst = arith.constant dense<0.000000e+00> : vector<64x512xf32>
    %7 = tpu.matmul %5, %6, %cst {dimension_numbers = #tpu.dot_dimension_numbers<[1], [0], [0], [1], [0, 0, 1, 1], [], []>} : vector<64x32xbf16>, vector<32x512xbf16>, vector<64x512xf32> -> vector<64x512xf32>
    %8 = vector.shape_cast %7 : vector<64x512xf32> to vector<8x8x512xf32>
    %c0_5 = arith.constant 0 : index
    %c0_6 = arith.constant 0 : index
    %c0_7 = arith.constant 0 : index
    %9 = vector.load %arg10[%c0_5, %c0_6, %c0_7] : memref<8x8x512xf32, #tpu.memory_space<vmem>>, vector<8x8x512xf32>
    tpu.vector_store %arg10[%c0_5, %c0_6, %c0_7], %8 {strides = array<i32>} : memref<8x8x512xf32, #tpu.memory_space<vmem>>, vector<8x8x512xf32>,
    %c0_8 = arith.constant 0 : index
    %c0_9 = arith.constant 0 : index
    %10 = vector.load %arg5[%c0_8, %c0_9] : memref<128x512xbf16, #tpu.memory_space<vmem>>, vector<128x512xbf16>
    %c0_10 = arith.constant 0 : index
    %c0_11 = arith.constant 0 : index
    %11 = vector.load %arg6[%c0_10, %c0_11] : memref<1x512xf32, #tpu.memory_space<vmem>>, vector<1x512xf32>
    %c0_12 = arith.constant 0 : index
    %c0_13 = arith.constant 0 : index
    %12 = vector.load %arg3[%c0_12, %c0_13] : memref<8x1xi32, #tpu.memory_space<vmem>>, vector<8x1xi32>
    %c8_i32 = arith.constant 8 : i32
    %13 = arith.muli %arg1, %c8_i32 : i32
    %c0_14 = arith.constant 0 : index
    %c0_15 = arith.constant 0 : index
    %14 = vector.load %arg11[%c0_14, %c0_15] : memref<8x128xf32, #tpu.memory_space<vmem>>, vector<8x128xf32>
    %c0_16 = arith.constant 0 : index
    %c0_17 = arith.constant 0 : index
    %15 = vector.load %arg12[%c0_16, %c0_17] : memref<8x128xf32, #tpu.memory_space<vmem>>, vector<8x128xf32>
    %c0_i32_18 = arith.constant 0 : i32
    %16 = arith.index_cast %c0_i32_18 : i32 to index
    %c0_19 = arith.constant 0 : index
    %c0_20 = arith.constant 0 : index
    %17 = vector.load %arg10[%16, %c0_19, %c0_20] : memref<8x8x512xf32, #tpu.memory_space<vmem>>, vector<1x8x512xf32>
    %18 = vector.shape_cast %17 : vector<1x8x512xf32> to vector<8x512xf32>
    %19 = arith.truncf %14 : vector<8x128xf32> to vector<8x128xbf16>
    %cst_21 = arith.constant dense<0.000000e+00> : vector<8x512xf32>
    %20 = tpu.matmul %19, %10, %cst_21 {dimension_numbers = #tpu.dot_dimension_numbers<[1], [0], [0], [1], [0, 0, 1, 1], [], []>} : vector<8x128xbf16>, vector<128x512xbf16>, vector<8x512xf32> -> vector<8x512xf32>
    %21 = arith.addf %18, %20 : vector<8x512xf32>
    %22 = vector.broadcast %11 : vector<1x512xf32> to vector<8x512xf32>
    %23 = arith.addf %21, %22 : vector<8x512xf32>
    %24 = vector.extract_strided_slice %23 {offsets = [0, 0], sizes = [8, 128], strides = [1, 1]} : vector<8x512xf32> to vector<8x128xf32>
    %cst_22 = arith.constant 5.000000e-01 : f32
    %25 = vector.broadcast %cst_22 : f32 to vector<8x128xf32>
    %26 = arith.mulf %25, %24 : vector<8x128xf32>
    %27 = math.tanh %26 : vector<8x128xf32>
    %cst_23 = arith.constant 1.000000e+00 : f32
    %28 = vector.broadcast %cst_23 : f32 to vector<8x128xf32>
    %29 = arith.addf %27, %28 : vector<8x128xf32>
    %cst_24 = arith.constant 5.000000e-01 : f32
    %30 = vector.broadcast %cst_24 : f32 to vector<8x128xf32>
    %31 = arith.mulf %30, %29 : vector<8x128xf32>
    %32 = vector.extract_strided_slice %23 {offsets = [0, 128], sizes = [8, 128], strides = [1, 1]} : vector<8x512xf32> to vector<8x128xf32>
    %cst_25 = arith.constant 5.000000e-01 : f32
    %33 = vector.broadcast %cst_25 : f32 to vector<8x128xf32>
    %34 = arith.mulf %33, %32 : vector<8x128xf32>
    %35 = math.tanh %34 : vector<8x128xf32>
    %cst_26 = arith.constant 1.000000e+00 : f32
    %36 = vector.broadcast %cst_26 : f32 to vector<8x128xf32>
    %37 = arith.addf %35, %36 : vector<8x128xf32>
    %cst_27 = arith.constant 5.000000e-01 : f32
    %38 = vector.broadcast %cst_27 : f32 to vector<8x128xf32>
    %39 = arith.mulf %38, %37 : vector<8x128xf32>
    %40 = vector.extract_strided_slice %23 {offsets = [0, 256], sizes = [8, 128], strides = [1, 1]} : vector<8x512xf32> to vector<8x128xf32>
    %41 = math.tanh %40 : vector<8x128xf32>
    %42 = vector.extract_strided_slice %23 {offsets = [0, 384], sizes = [8, 128], strides = [1, 1]} : vector<8x512xf32> to vector<8x128xf32>
    %cst_28 = arith.constant 5.000000e-01 : f32
    %43 = vector.broadcast %cst_28 : f32 to vector<8x128xf32>
    %44 = arith.mulf %43, %42 : vector<8x128xf32>
    %45 = math.tanh %44 : vector<8x128xf32>
    %cst_29 = arith.constant 1.000000e+00 : f32
    %46 = vector.broadcast %cst_29 : f32 to vector<8x128xf32>
    %47 = arith.addf %45, %46 : vector<8x128xf32>
    %cst_30 = arith.constant 5.000000e-01 : f32
    %48 = vector.broadcast %cst_30 : f32 to vector<8x128xf32>
    %49 = arith.mulf %48, %47 : vector<8x128xf32>
    %50 = arith.mulf %39, %15 : vector<8x128xf32>
    %51 = arith.mulf %31, %41 : vector<8x128xf32>
    %52 = arith.addf %50, %51 : vector<8x128xf32>
    %53 = math.tanh %52 : vector<8x128xf32>
    %54 = arith.mulf %49, %53 : vector<8x128xf32>
    %55 = arith.addi %13, %c0_i32_18 : i32
    %56 = vector.broadcast %55 : i32 to vector<8x1xi32>
    %57 = arith.cmpi sgt, %12, %56 : vector<8x1xi32>
    %58 = vector.shape_cast %57 : vector<8x1xi1> to vector<8x1xi1>
    %59 = vector.broadcast %58 : vector<8x1xi1> to vector<8x128xi1>
    %60 = arith.select %59, %54, %14 : vector<8x128xi1>, vector<8x128xf32>
    %61 = vector.shape_cast %57 : vector<8x1xi1> to vector<8x1xi1>
    %62 = vector.broadcast %61 : vector<8x1xi1> to vector<8x128xi1>
    %63 = arith.select %62, %52, %15 : vector<8x128xi1>, vector<8x128xf32>
    %c1_i32 = arith.constant 1 : i32
    %64 = arith.index_cast %c1_i32 : i32 to index
    %c0_31 = arith.constant 0 : index
    %c0_32 = arith.constant 0 : index
    %65 = vector.load %arg10[%64, %c0_31, %c0_32] : memref<8x8x512xf32, #tpu.memory_space<vmem>>, vector<1x8x512xf32>
    %66 = vector.shape_cast %65 : vector<1x8x512xf32> to vector<8x512xf32>
    %67 = arith.truncf %60 : vector<8x128xf32> to vector<8x128xbf16>
    %cst_33 = arith.constant dense<0.000000e+00> : vector<8x512xf32>
    %68 = tpu.matmul %67, %10, %cst_33 {dimension_numbers = #tpu.dot_dimension_numbers<[1], [0], [0], [1], [0, 0, 1, 1], [], []>} : vector<8x128xbf16>, vector<128x512xbf16>, vector<8x512xf32> -> vector<8x512xf32>
    %69 = arith.addf %66, %68 : vector<8x512xf32>
    %70 = vector.broadcast %11 : vector<1x512xf32> to vector<8x512xf32>
    %71 = arith.addf %69, %70 : vector<8x512xf32>
    %72 = vector.extract_strided_slice %71 {offsets = [0, 0], sizes = [8, 128], strides = [1, 1]} : vector<8x512xf32> to vector<8x128xf32>
    %cst_34 = arith.constant 5.000000e-01 : f32
    %73 = vector.broadcast %cst_34 : f32 to vector<8x128xf32>
    %74 = arith.mulf %73, %72 : vector<8x128xf32>
    %75 = math.tanh %74 : vector<8x128xf32>
    %cst_35 = arith.constant 1.000000e+00 : f32
    %76 = vector.broadcast %cst_35 : f32 to vector<8x128xf32>
    %77 = arith.addf %75, %76 : vector<8x128xf32>
    %cst_36 = arith.constant 5.000000e-01 : f32
    %78 = vector.broadcast %cst_36 : f32 to vector<8x128xf32>
    %79 = arith.mulf %78, %77 : vector<8x128xf32>
    %80 = vector.extract_strided_slice %71 {offsets = [0, 128], sizes = [8, 128], strides = [1, 1]} : vector<8x512xf32> to vector<8x128xf32>
    %cst_37 = arith.constant 5.000000e-01 : f32
    %81 = vector.broadcast %cst_37 : f32 to vector<8x128xf32>
    %82 = arith.mulf %81, %80 : vector<8x128xf32>
    %83 = math.tanh %82 : vector<8x128xf32>
    %cst_38 = arith.constant 1.000000e+00 : f32
    %84 = vector.broadcast %cst_38 : f32 to vector<8x128xf32>
    %85 = arith.addf %83, %84 : vector<8x128xf32>
    %cst_39 = arith.constant 5.000000e-01 : f32
    %86 = vector.broadcast %cst_39 : f32 to vector<8x128xf32>
    %87 = arith.mulf %86, %85 : vector<8x128xf32>
    %88 = vector.extract_strided_slice %71 {offsets = [0, 256], sizes = [8, 128], strides = [1, 1]} : vector<8x512xf32> to vector<8x128xf32>
    %89 = math.tanh %88 : vector<8x128xf32>
    %90 = vector.extract_strided_slice %71 {offsets = [0, 384], sizes = [8, 128], strides = [1, 1]} : vector<8x512xf32> to vector<8x128xf32>
    %cst_40 = arith.constant 5.000000e-01 : f32
    %91 = vector.broadcast %cst_40 : f32 to vector<8x128xf32>
    %92 = arith.mulf %91, %90 : vector<8x128xf32>
    %93 = math.tanh %92 : vector<8x128xf32>
    %cst_41 = arith.constant 1.000000e+00 : f32
    %94 = vector.broadcast %cst_41 : f32 to vector<8x128xf32>
    %95 = arith.addf %93, %94 : vector<8x128xf32>
    %cst_42 = arith.constant 5.000000e-01 : f32
    %96 = vector.broadcast %cst_42 : f32 to vector<8x128xf32>
    %97 = arith.mulf %96, %95 : vector<8x128xf32>
    %98 = arith.mulf %87, %63 : vector<8x128xf32>
    %99 = arith.mulf %79, %89 : vector<8x128xf32>
    %100 = arith.addf %98, %99 : vector<8x128xf32>
    %101 = math.tanh %100 : vector<8x128xf32>
    %102 = arith.mulf %97, %101 : vector<8x128xf32>
    %103 = arith.addi %13, %c1_i32 : i32
    %104 = vector.broadcast %103 : i32 to vector<8x1xi32>
    %105 = arith.cmpi sgt, %12, %104 : vector<8x1xi32>
    %106 = vector.shape_cast %105 : vector<8x1xi1> to vector<8x1xi1>
    %107 = vector.broadcast %106 : vector<8x1xi1> to vector<8x128xi1>
    %108 = arith.select %107, %102, %60 : vector<8x128xi1>, vector<8x128xf32>
    %109 = vector.shape_cast %105 : vector<8x1xi1> to vector<8x1xi1>
    %110 = vector.broadcast %109 : vector<8x1xi1> to vector<8x128xi1>
    %111 = arith.select %110, %100, %63 : vector<8x128xi1>, vector<8x128xf32>
    %c2_i32 = arith.constant 2 : i32
    %112 = arith.index_cast %c2_i32 : i32 to index
    %c0_43 = arith.constant 0 : index
    %c0_44 = arith.constant 0 : index
    %113 = vector.load %arg10[%112, %c0_43, %c0_44] : memref<8x8x512xf32, #tpu.memory_space<vmem>>, vector<1x8x512xf32>
    %114 = vector.shape_cast %113 : vector<1x8x512xf32> to vector<8x512xf32>
    %115 = arith.truncf %108 : vector<8x128xf32> to vector<8x128xbf16>
    %cst_45 = arith.constant dense<0.000000e+00> : vector<8x512xf32>
    %116 = tpu.matmul %115, %10, %cst_45 {dimension_numbers = #tpu.dot_dimension_numbers<[1], [0], [0], [1], [0, 0, 1, 1], [], []>} : vector<8x128xbf16>, vector<128x512xbf16>, vector<8x512xf32> -> vector<8x512xf32>
    %117 = arith.addf %114, %116 : vector<8x512xf32>
    %118 = vector.broadcast %11 : vector<1x512xf32> to vector<8x512xf32>
    %119 = arith.addf %117, %118 : vector<8x512xf32>
    %120 = vector.extract_strided_slice %119 {offsets = [0, 0], sizes = [8, 128], strides = [1, 1]} : vector<8x512xf32> to vector<8x128xf32>
    %cst_46 = arith.constant 5.000000e-01 : f32
    %121 = vector.broadcast %cst_46 : f32 to vector<8x128xf32>
    %122 = arith.mulf %121, %120 : vector<8x128xf32>
    %123 = math.tanh %122 : vector<8x128xf32>
    %cst_47 = arith.constant 1.000000e+00 : f32
    %124 = vector.broadcast %cst_47 : f32 to vector<8x128xf32>
    %125 = arith.addf %123, %124 : vector<8x128xf32>
    %cst_48 = arith.constant 5.000000e-01 : f32
    %126 = vector.broadcast %cst_48 : f32 to vector<8x128xf32>
    %127 = arith.mulf %126, %125 : vector<8x128xf32>
    %128 = vector.extract_strided_slice %119 {offsets = [0, 128], sizes = [8, 128], strides = [1, 1]} : vector<8x512xf32> to vector<8x128xf32>
    %cst_49 = arith.constant 5.000000e-01 : f32
    %129 = vector.broadcast %cst_49 : f32 to vector<8x128xf32>
    %130 = arith.mulf %129, %128 : vector<8x128xf32>
    %131 = math.tanh %130 : vector<8x128xf32>
    %cst_50 = arith.constant 1.000000e+00 : f32
    %132 = vector.broadcast %cst_50 : f32 to vector<8x128xf32>
    %133 = arith.addf %131, %132 : vector<8x128xf32>
    %cst_51 = arith.constant 5.000000e-01 : f32
    %134 = vector.broadcast %cst_51 : f32 to vector<8x128xf32>
    %135 = arith.mulf %134, %133 : vector<8x128xf32>
    %136 = vector.extract_strided_slice %119 {offsets = [0, 256], sizes = [8, 128], strides = [1, 1]} : vector<8x512xf32> to vector<8x128xf32>
    %137 = math.tanh %136 : vector<8x128xf32>
    %138 = vector.extract_strided_slice %119 {offsets = [0, 384], sizes = [8, 128], strides = [1, 1]} : vector<8x512xf32> to vector<8x128xf32>
    %cst_52 = arith.constant 5.000000e-01 : f32
    %139 = vector.broadcast %cst_52 : f32 to vector<8x128xf32>
    %140 = arith.mulf %139, %138 : vector<8x128xf32>
    %141 = math.tanh %140 : vector<8x128xf32>
    %cst_53 = arith.constant 1.000000e+00 : f32
    %142 = vector.broadcast %cst_53 : f32 to vector<8x128xf32>
    %143 = arith.addf %141, %142 : vector<8x128xf32>
    %cst_54 = arith.constant 5.000000e-01 : f32
    %144 = vector.broadcast %cst_54 : f32 to vector<8x128xf32>
    %145 = arith.mulf %144, %143 : vector<8x128xf32>
    %146 = arith.mulf %135, %111 : vector<8x128xf32>
    %147 = arith.mulf %127, %137 : vector<8x128xf32>
    %148 = arith.addf %146, %147 : vector<8x128xf32>
    %149 = math.tanh %148 : vector<8x128xf32>
    %150 = arith.mulf %145, %149 : vector<8x128xf32>
    %151 = arith.addi %13, %c2_i32 : i32
    %152 = vector.broadcast %151 : i32 to vector<8x1xi32>
    %153 = arith.cmpi sgt, %12, %152 : vector<8x1xi32>
    %154 = vector.shape_cast %153 : vector<8x1xi1> to vector<8x1xi1>
    %155 = vector.broadcast %154 : vector<8x1xi1> to vector<8x128xi1>
    %156 = arith.select %155, %150, %108 : vector<8x128xi1>, vector<8x128xf32>
    %157 = vector.shape_cast %153 : vector<8x1xi1> to vector<8x1xi1>
    %158 = vector.broadcast %157 : vector<8x1xi1> to vector<8x128xi1>
    %159 = arith.select %158, %148, %111 : vector<8x128xi1>, vector<8x128xf32>
    %c3_i32 = arith.constant 3 : i32
    %160 = arith.index_cast %c3_i32 : i32 to index
    %c0_55 = arith.constant 0 : index
    %c0_56 = arith.constant 0 : index
    %161 = vector.load %arg10[%160, %c0_55, %c0_56] : memref<8x8x512xf32, #tpu.memory_space<vmem>>, vector<1x8x512xf32>
    %162 = vector.shape_cast %161 : vector<1x8x512xf32> to vector<8x512xf32>
    %163 = arith.truncf %156 : vector<8x128xf32> to vector<8x128xbf16>
    %cst_57 = arith.constant dense<0.000000e+00> : vector<8x512xf32>
    %164 = tpu.matmul %163, %10, %cst_57 {dimension_numbers = #tpu.dot_dimension_numbers<[1], [0], [0], [1], [0, 0, 1, 1], [], []>} : vector<8x128xbf16>, vector<128x512xbf16>, vector<8x512xf32> -> vector<8x512xf32>
    %165 = arith.addf %162, %164 : vector<8x512xf32>
    %166 = vector.broadcast %11 : vector<1x512xf32> to vector<8x512xf32>
    %167 = arith.addf %165, %166 : vector<8x512xf32>
    %168 = vector.extract_strided_slice %167 {offsets = [0, 0], sizes = [8, 128], strides = [1, 1]} : vector<8x512xf32> to vector<8x128xf32>
    %cst_58 = arith.constant 5.000000e-01 : f32
    %169 = vector.broadcast %cst_58 : f32 to vector<8x128xf32>
    %170 = arith.mulf %169, %168 : vector<8x128xf32>
    %171 = math.tanh %170 : vector<8x128xf32>
    %cst_59 = arith.constant 1.000000e+00 : f32
    %172 = vector.broadcast %cst_59 : f32 to vector<8x128xf32>
    %173 = arith.addf %171, %172 : vector<8x128xf32>
    %cst_60 = arith.constant 5.000000e-01 : f32
    %174 = vector.broadcast %cst_60 : f32 to vector<8x128xf32>
    %175 = arith.mulf %174, %173 : vector<8x128xf32>
    %176 = vector.extract_strided_slice %167 {offsets = [0, 128], sizes = [8, 128], strides = [1, 1]} : vector<8x512xf32> to vector<8x128xf32>
    %cst_61 = arith.constant 5.000000e-01 : f32
    %177 = vector.broadcast %cst_61 : f32 to vector<8x128xf32>
    %178 = arith.mulf %177, %176 : vector<8x128xf32>
    %179 = math.tanh %178 : vector<8x128xf32>
    %cst_62 = arith.constant 1.000000e+00 : f32
    %180 = vector.broadcast %cst_62 : f32 to vector<8x128xf32>
    %181 = arith.addf %179, %180 : vector<8x128xf32>
    %cst_63 = arith.constant 5.000000e-01 : f32
    %182 = vector.broadcast %cst_63 : f32 to vector<8x128xf32>
    %183 = arith.mulf %182, %181 : vector<8x128xf32>
    %184 = vector.extract_strided_slice %167 {offsets = [0, 256], sizes = [8, 128], strides = [1, 1]} : vector<8x512xf32> to vector<8x128xf32>
    %185 = math.tanh %184 : vector<8x128xf32>
    %186 = vector.extract_strided_slice %167 {offsets = [0, 384], sizes = [8, 128], strides = [1, 1]} : vector<8x512xf32> to vector<8x128xf32>
    %cst_64 = arith.constant 5.000000e-01 : f32
    %187 = vector.broadcast %cst_64 : f32 to vector<8x128xf32>
    %188 = arith.mulf %187, %186 : vector<8x128xf32>
    %189 = math.tanh %188 : vector<8x128xf32>
    %cst_65 = arith.constant 1.000000e+00 : f32
    %190 = vector.broadcast %cst_65 : f32 to vector<8x128xf32>
    %191 = arith.addf %189, %190 : vector<8x128xf32>
    %cst_66 = arith.constant 5.000000e-01 : f32
    %192 = vector.broadcast %cst_66 : f32 to vector<8x128xf32>
    %193 = arith.mulf %192, %191 : vector<8x128xf32>
    %194 = arith.mulf %183, %159 : vector<8x128xf32>
    %195 = arith.mulf %175, %185 : vector<8x128xf32>
    %196 = arith.addf %194, %195 : vector<8x128xf32>
    %197 = math.tanh %196 : vector<8x128xf32>
    %198 = arith.mulf %193, %197 : vector<8x128xf32>
    %199 = arith.addi %13, %c3_i32 : i32
    %200 = vector.broadcast %199 : i32 to vector<8x1xi32>
    %201 = arith.cmpi sgt, %12, %200 : vector<8x1xi32>
    %202 = vector.shape_cast %201 : vector<8x1xi1> to vector<8x1xi1>
    %203 = vector.broadcast %202 : vector<8x1xi1> to vector<8x128xi1>
    %204 = arith.select %203, %198, %156 : vector<8x128xi1>, vector<8x128xf32>
    %205 = vector.shape_cast %201 : vector<8x1xi1> to vector<8x1xi1>
    %206 = vector.broadcast %205 : vector<8x1xi1> to vector<8x128xi1>
    %207 = arith.select %206, %196, %159 : vector<8x128xi1>, vector<8x128xf32>
    %c4_i32 = arith.constant 4 : i32
    %208 = arith.index_cast %c4_i32 : i32 to index
    %c0_67 = arith.constant 0 : index
    %c0_68 = arith.constant 0 : index
    %209 = vector.load %arg10[%208, %c0_67, %c0_68] : memref<8x8x512xf32, #tpu.memory_space<vmem>>, vector<1x8x512xf32>
    %210 = vector.shape_cast %209 : vector<1x8x512xf32> to vector<8x512xf32>
    %211 = arith.truncf %204 : vector<8x128xf32> to vector<8x128xbf16>
    %cst_69 = arith.constant dense<0.000000e+00> : vector<8x512xf32>
    %212 = tpu.matmul %211, %10, %cst_69 {dimension_numbers = #tpu.dot_dimension_numbers<[1], [0], [0], [1], [0, 0, 1, 1], [], []>} : vector<8x128xbf16>, vector<128x512xbf16>, vector<8x512xf32> -> vector<8x512xf32>
    %213 = arith.addf %210, %212 : vector<8x512xf32>
    %214 = vector.broadcast %11 : vector<1x512xf32> to vector<8x512xf32>
    %215 = arith.addf %213, %214 : vector<8x512xf32>
    %216 = vector.extract_strided_slice %215 {offsets = [0, 0], sizes = [8, 128], strides = [1, 1]} : vector<8x512xf32> to vector<8x128xf32>
    %cst_70 = arith.constant 5.000000e-01 : f32
    %217 = vector.broadcast %cst_70 : f32 to vector<8x128xf32>
    %218 = arith.mulf %217, %216 : vector<8x128xf32>
    %219 = math.tanh %218 : vector<8x128xf32>
    %cst_71 = arith.constant 1.000000e+00 : f32
    %220 = vector.broadcast %cst_71 : f32 to vector<8x128xf32>
    %221 = arith.addf %219, %220 : vector<8x128xf32>
    %cst_72 = arith.constant 5.000000e-01 : f32
    %222 = vector.broadcast %cst_72 : f32 to vector<8x128xf32>
    %223 = arith.mulf %222, %221 : vector<8x128xf32>
    %224 = vector.extract_strided_slice %215 {offsets = [0, 128], sizes = [8, 128], strides = [1, 1]} : vector<8x512xf32> to vector<8x128xf32>
    %cst_73 = arith.constant 5.000000e-01 : f32
    %225 = vector.broadcast %cst_73 : f32 to vector<8x128xf32>
    %226 = arith.mulf %225, %224 : vector<8x128xf32>
    %227 = math.tanh %226 : vector<8x128xf32>
    %cst_74 = arith.constant 1.000000e+00 : f32
    %228 = vector.broadcast %cst_74 : f32 to vector<8x128xf32>
    %229 = arith.addf %227, %228 : vector<8x128xf32>
    %cst_75 = arith.constant 5.000000e-01 : f32
    %230 = vector.broadcast %cst_75 : f32 to vector<8x128xf32>
    %231 = arith.mulf %230, %229 : vector<8x128xf32>
    %232 = vector.extract_strided_slice %215 {offsets = [0, 256], sizes = [8, 128], strides = [1, 1]} : vector<8x512xf32> to vector<8x128xf32>
    %233 = math.tanh %232 : vector<8x128xf32>
    %234 = vector.extract_strided_slice %215 {offsets = [0, 384], sizes = [8, 128], strides = [1, 1]} : vector<8x512xf32> to vector<8x128xf32>
    %cst_76 = arith.constant 5.000000e-01 : f32
    %235 = vector.broadcast %cst_76 : f32 to vector<8x128xf32>
    %236 = arith.mulf %235, %234 : vector<8x128xf32>
    %237 = math.tanh %236 : vector<8x128xf32>
    %cst_77 = arith.constant 1.000000e+00 : f32
    %238 = vector.broadcast %cst_77 : f32 to vector<8x128xf32>
    %239 = arith.addf %237, %238 : vector<8x128xf32>
    %cst_78 = arith.constant 5.000000e-01 : f32
    %240 = vector.broadcast %cst_78 : f32 to vector<8x128xf32>
    %241 = arith.mulf %240, %239 : vector<8x128xf32>
    %242 = arith.mulf %231, %207 : vector<8x128xf32>
    %243 = arith.mulf %223, %233 : vector<8x128xf32>
    %244 = arith.addf %242, %243 : vector<8x128xf32>
    %245 = math.tanh %244 : vector<8x128xf32>
    %246 = arith.mulf %241, %245 : vector<8x128xf32>
    %247 = arith.addi %13, %c4_i32 : i32
    %248 = vector.broadcast %247 : i32 to vector<8x1xi32>
    %249 = arith.cmpi sgt, %12, %248 : vector<8x1xi32>
    %250 = vector.shape_cast %249 : vector<8x1xi1> to vector<8x1xi1>
    %251 = vector.broadcast %250 : vector<8x1xi1> to vector<8x128xi1>
    %252 = arith.select %251, %246, %204 : vector<8x128xi1>, vector<8x128xf32>
    %253 = vector.shape_cast %249 : vector<8x1xi1> to vector<8x1xi1>
    %254 = vector.broadcast %253 : vector<8x1xi1> to vector<8x128xi1>
    %255 = arith.select %254, %244, %207 : vector<8x128xi1>, vector<8x128xf32>
    %c5_i32 = arith.constant 5 : i32
    %256 = arith.index_cast %c5_i32 : i32 to index
    %c0_79 = arith.constant 0 : index
    %c0_80 = arith.constant 0 : index
    %257 = vector.load %arg10[%256, %c0_79, %c0_80] : memref<8x8x512xf32, #tpu.memory_space<vmem>>, vector<1x8x512xf32>
    %258 = vector.shape_cast %257 : vector<1x8x512xf32> to vector<8x512xf32>
    %259 = arith.truncf %252 : vector<8x128xf32> to vector<8x128xbf16>
    %cst_81 = arith.constant dense<0.000000e+00> : vector<8x512xf32>
    %260 = tpu.matmul %259, %10, %cst_81 {dimension_numbers = #tpu.dot_dimension_numbers<[1], [0], [0], [1], [0, 0, 1, 1], [], []>} : vector<8x128xbf16>, vector<128x512xbf16>, vector<8x512xf32> -> vector<8x512xf32>
    %261 = arith.addf %258, %260 : vector<8x512xf32>
    %262 = vector.broadcast %11 : vector<1x512xf32> to vector<8x512xf32>
    %263 = arith.addf %261, %262 : vector<8x512xf32>
    %264 = vector.extract_strided_slice %263 {offsets = [0, 0], sizes = [8, 128], strides = [1, 1]} : vector<8x512xf32> to vector<8x128xf32>
    %cst_82 = arith.constant 5.000000e-01 : f32
    %265 = vector.broadcast %cst_82 : f32 to vector<8x128xf32>
    %266 = arith.mulf %265, %264 : vector<8x128xf32>
    %267 = math.tanh %266 : vector<8x128xf32>
    %cst_83 = arith.constant 1.000000e+00 : f32
    %268 = vector.broadcast %cst_83 : f32 to vector<8x128xf32>
    %269 = arith.addf %267, %268 : vector<8x128xf32>
    %cst_84 = arith.constant 5.000000e-01 : f32
    %270 = vector.broadcast %cst_84 : f32 to vector<8x128xf32>
    %271 = arith.mulf %270, %269 : vector<8x128xf32>
    %272 = vector.extract_strided_slice %263 {offsets = [0, 128], sizes = [8, 128], strides = [1, 1]} : vector<8x512xf32> to vector<8x128xf32>
    %cst_85 = arith.constant 5.000000e-01 : f32
    %273 = vector.broadcast %cst_85 : f32 to vector<8x128xf32>
    %274 = arith.mulf %273, %272 : vector<8x128xf32>
    %275 = math.tanh %274 : vector<8x128xf32>
    %cst_86 = arith.constant 1.000000e+00 : f32
    %276 = vector.broadcast %cst_86 : f32 to vector<8x128xf32>
    %277 = arith.addf %275, %276 : vector<8x128xf32>
    %cst_87 = arith.constant 5.000000e-01 : f32
    %278 = vector.broadcast %cst_87 : f32 to vector<8x128xf32>
    %279 = arith.mulf %278, %277 : vector<8x128xf32>
    %280 = vector.extract_strided_slice %263 {offsets = [0, 256], sizes = [8, 128], strides = [1, 1]} : vector<8x512xf32> to vector<8x128xf32>
    %281 = math.tanh %280 : vector<8x128xf32>
    %282 = vector.extract_strided_slice %263 {offsets = [0, 384], sizes = [8, 128], strides = [1, 1]} : vector<8x512xf32> to vector<8x128xf32>
    %cst_88 = arith.constant 5.000000e-01 : f32
    %283 = vector.broadcast %cst_88 : f32 to vector<8x128xf32>
    %284 = arith.mulf %283, %282 : vector<8x128xf32>
    %285 = math.tanh %284 : vector<8x128xf32>
    %cst_89 = arith.constant 1.000000e+00 : f32
    %286 = vector.broadcast %cst_89 : f32 to vector<8x128xf32>
    %287 = arith.addf %285, %286 : vector<8x128xf32>
    %cst_90 = arith.constant 5.000000e-01 : f32
    %288 = vector.broadcast %cst_90 : f32 to vector<8x128xf32>
    %289 = arith.mulf %288, %287 : vector<8x128xf32>
    %290 = arith.mulf %279, %255 : vector<8x128xf32>
    %291 = arith.mulf %271, %281 : vector<8x128xf32>
    %292 = arith.addf %290, %291 : vector<8x128xf32>
    %293 = math.tanh %292 : vector<8x128xf32>
    %294 = arith.mulf %289, %293 : vector<8x128xf32>
    %295 = arith.addi %13, %c5_i32 : i32
    %296 = vector.broadcast %295 : i32 to vector<8x1xi32>
    %297 = arith.cmpi sgt, %12, %296 : vector<8x1xi32>
    %298 = vector.shape_cast %297 : vector<8x1xi1> to vector<8x1xi1>
    %299 = vector.broadcast %298 : vector<8x1xi1> to vector<8x128xi1>
    %300 = arith.select %299, %294, %252 : vector<8x128xi1>, vector<8x128xf32>
    %301 = vector.shape_cast %297 : vector<8x1xi1> to vector<8x1xi1>
    %302 = vector.broadcast %301 : vector<8x1xi1> to vector<8x128xi1>
    %303 = arith.select %302, %292, %255 : vector<8x128xi1>, vector<8x128xf32>
    %c6_i32 = arith.constant 6 : i32
    %304 = arith.index_cast %c6_i32 : i32 to index
    %c0_91 = arith.constant 0 : index
    %c0_92 = arith.constant 0 : index
    %305 = vector.load %arg10[%304, %c0_91, %c0_92] : memref<8x8x512xf32, #tpu.memory_space<vmem>>, vector<1x8x512xf32>
    %306 = vector.shape_cast %305 : vector<1x8x512xf32> to vector<8x512xf32>
    %307 = arith.truncf %300 : vector<8x128xf32> to vector<8x128xbf16>
    %cst_93 = arith.constant dense<0.000000e+00> : vector<8x512xf32>
    %308 = tpu.matmul %307, %10, %cst_93 {dimension_numbers = #tpu.dot_dimension_numbers<[1], [0], [0], [1], [0, 0, 1, 1], [], []>} : vector<8x128xbf16>, vector<128x512xbf16>, vector<8x512xf32> -> vector<8x512xf32>
    %309 = arith.addf %306, %308 : vector<8x512xf32>
    %310 = vector.broadcast %11 : vector<1x512xf32> to vector<8x512xf32>
    %311 = arith.addf %309, %310 : vector<8x512xf32>
    %312 = vector.extract_strided_slice %311 {offsets = [0, 0], sizes = [8, 128], strides = [1, 1]} : vector<8x512xf32> to vector<8x128xf32>
    %cst_94 = arith.constant 5.000000e-01 : f32
    %313 = vector.broadcast %cst_94 : f32 to vector<8x128xf32>
    %314 = arith.mulf %313, %312 : vector<8x128xf32>
    %315 = math.tanh %314 : vector<8x128xf32>
    %cst_95 = arith.constant 1.000000e+00 : f32
    %316 = vector.broadcast %cst_95 : f32 to vector<8x128xf32>
    %317 = arith.addf %315, %316 : vector<8x128xf32>
    %cst_96 = arith.constant 5.000000e-01 : f32
    %318 = vector.broadcast %cst_96 : f32 to vector<8x128xf32>
    %319 = arith.mulf %318, %317 : vector<8x128xf32>
    %320 = vector.extract_strided_slice %311 {offsets = [0, 128], sizes = [8, 128], strides = [1, 1]} : vector<8x512xf32> to vector<8x128xf32>
    %cst_97 = arith.constant 5.000000e-01 : f32
    %321 = vector.broadcast %cst_97 : f32 to vector<8x128xf32>
    %322 = arith.mulf %321, %320 : vector<8x128xf32>
    %323 = math.tanh %322 : vector<8x128xf32>
    %cst_98 = arith.constant 1.000000e+00 : f32
    %324 = vector.broadcast %cst_98 : f32 to vector<8x128xf32>
    %325 = arith.addf %323, %324 : vector<8x128xf32>
    %cst_99 = arith.constant 5.000000e-01 : f32
    %326 = vector.broadcast %cst_99 : f32 to vector<8x128xf32>
    %327 = arith.mulf %326, %325 : vector<8x128xf32>
    %328 = vector.extract_strided_slice %311 {offsets = [0, 256], sizes = [8, 128], strides = [1, 1]} : vector<8x512xf32> to vector<8x128xf32>
    %329 = math.tanh %328 : vector<8x128xf32>
    %330 = vector.extract_strided_slice %311 {offsets = [0, 384], sizes = [8, 128], strides = [1, 1]} : vector<8x512xf32> to vector<8x128xf32>
    %cst_100 = arith.constant 5.000000e-01 : f32
    %331 = vector.broadcast %cst_100 : f32 to vector<8x128xf32>
    %332 = arith.mulf %331, %330 : vector<8x128xf32>
    %333 = math.tanh %332 : vector<8x128xf32>
    %cst_101 = arith.constant 1.000000e+00 : f32
    %334 = vector.broadcast %cst_101 : f32 to vector<8x128xf32>
    %335 = arith.addf %333, %334 : vector<8x128xf32>
    %cst_102 = arith.constant 5.000000e-01 : f32
    %336 = vector.broadcast %cst_102 : f32 to vector<8x128xf32>
    %337 = arith.mulf %336, %335 : vector<8x128xf32>
    %338 = arith.mulf %327, %303 : vector<8x128xf32>
    %339 = arith.mulf %319, %329 : vector<8x128xf32>
    %340 = arith.addf %338, %339 : vector<8x128xf32>
    %341 = math.tanh %340 : vector<8x128xf32>
    %342 = arith.mulf %337, %341 : vector<8x128xf32>
    %343 = arith.addi %13, %c6_i32 : i32
    %344 = vector.broadcast %343 : i32 to vector<8x1xi32>
    %345 = arith.cmpi sgt, %12, %344 : vector<8x1xi32>
    %346 = vector.shape_cast %345 : vector<8x1xi1> to vector<8x1xi1>
    %347 = vector.broadcast %346 : vector<8x1xi1> to vector<8x128xi1>
    %348 = arith.select %347, %342, %300 : vector<8x128xi1>, vector<8x128xf32>
    %349 = vector.shape_cast %345 : vector<8x1xi1> to vector<8x1xi1>
    %350 = vector.broadcast %349 : vector<8x1xi1> to vector<8x128xi1>
    %351 = arith.select %350, %340, %303 : vector<8x128xi1>, vector<8x128xf32>
    %c7_i32 = arith.constant 7 : i32
    %352 = arith.index_cast %c7_i32 : i32 to index
    %c0_103 = arith.constant 0 : index
    %c0_104 = arith.constant 0 : index
    %353 = vector.load %arg10[%352, %c0_103, %c0_104] : memref<8x8x512xf32, #tpu.memory_space<vmem>>, vector<1x8x512xf32>
    %354 = vector.shape_cast %353 : vector<1x8x512xf32> to vector<8x512xf32>
    %355 = arith.truncf %348 : vector<8x128xf32> to vector<8x128xbf16>
    %cst_105 = arith.constant dense<0.000000e+00> : vector<8x512xf32>
    %356 = tpu.matmul %355, %10, %cst_105 {dimension_numbers = #tpu.dot_dimension_numbers<[1], [0], [0], [1], [0, 0, 1, 1], [], []>} : vector<8x128xbf16>, vector<128x512xbf16>, vector<8x512xf32> -> vector<8x512xf32>
    %357 = arith.addf %354, %356 : vector<8x512xf32>
    %358 = vector.broadcast %11 : vector<1x512xf32> to vector<8x512xf32>
    %359 = arith.addf %357, %358 : vector<8x512xf32>
    %360 = vector.extract_strided_slice %359 {offsets = [0, 0], sizes = [8, 128], strides = [1, 1]} : vector<8x512xf32> to vector<8x128xf32>
    %cst_106 = arith.constant 5.000000e-01 : f32
    %361 = vector.broadcast %cst_106 : f32 to vector<8x128xf32>
    %362 = arith.mulf %361, %360 : vector<8x128xf32>
    %363 = math.tanh %362 : vector<8x128xf32>
    %cst_107 = arith.constant 1.000000e+00 : f32
    %364 = vector.broadcast %cst_107 : f32 to vector<8x128xf32>
    %365 = arith.addf %363, %364 : vector<8x128xf32>
    %cst_108 = arith.constant 5.000000e-01 : f32
    %366 = vector.broadcast %cst_108 : f32 to vector<8x128xf32>
    %367 = arith.mulf %366, %365 : vector<8x128xf32>
    %368 = vector.extract_strided_slice %359 {offsets = [0, 128], sizes = [8, 128], strides = [1, 1]} : vector<8x512xf32> to vector<8x128xf32>
    %cst_109 = arith.constant 5.000000e-01 : f32
    %369 = vector.broadcast %cst_109 : f32 to vector<8x128xf32>
    %370 = arith.mulf %369, %368 : vector<8x128xf32>
    %371 = math.tanh %370 : vector<8x128xf32>
    %cst_110 = arith.constant 1.000000e+00 : f32
    %372 = vector.broadcast %cst_110 : f32 to vector<8x128xf32>
    %373 = arith.addf %371, %372 : vector<8x128xf32>
    %cst_111 = arith.constant 5.000000e-01 : f32
    %374 = vector.broadcast %cst_111 : f32 to vector<8x128xf32>
    %375 = arith.mulf %374, %373 : vector<8x128xf32>
    %376 = vector.extract_strided_slice %359 {offsets = [0, 256], sizes = [8, 128], strides = [1, 1]} : vector<8x512xf32> to vector<8x128xf32>
    %377 = math.tanh %376 : vector<8x128xf32>
    %378 = vector.extract_strided_slice %359 {offsets = [0, 384], sizes = [8, 128], strides = [1, 1]} : vector<8x512xf32> to vector<8x128xf32>
    %cst_112 = arith.constant 5.000000e-01 : f32
    %379 = vector.broadcast %cst_112 : f32 to vector<8x128xf32>
    %380 = arith.mulf %379, %378 : vector<8x128xf32>
    %381 = math.tanh %380 : vector<8x128xf32>
    %cst_113 = arith.constant 1.000000e+00 : f32
    %382 = vector.broadcast %cst_113 : f32 to vector<8x128xf32>
    %383 = arith.addf %381, %382 : vector<8x128xf32>
    %cst_114 = arith.constant 5.000000e-01 : f32
    %384 = vector.broadcast %cst_114 : f32 to vector<8x128xf32>
    %385 = arith.mulf %384, %383 : vector<8x128xf32>
    %386 = arith.mulf %375, %351 : vector<8x128xf32>
    %387 = arith.mulf %367, %377 : vector<8x128xf32>
    %388 = arith.addf %386, %387 : vector<8x128xf32>
    %389 = math.tanh %388 : vector<8x128xf32>
    %390 = arith.mulf %385, %389 : vector<8x128xf32>
    %391 = arith.addi %13, %c7_i32 : i32
    %392 = vector.broadcast %391 : i32 to vector<8x1xi32>
    %393 = arith.cmpi sgt, %12, %392 : vector<8x1xi32>
    %394 = vector.shape_cast %393 : vector<8x1xi1> to vector<8x1xi1>
    %395 = vector.broadcast %394 : vector<8x1xi1> to vector<8x128xi1>
    %396 = arith.select %395, %390, %348 : vector<8x128xi1>, vector<8x128xf32>
    %397 = vector.shape_cast %393 : vector<8x1xi1> to vector<8x1xi1>
    %398 = vector.broadcast %397 : vector<8x1xi1> to vector<8x128xi1>
    %399 = arith.select %398, %388, %351 : vector<8x128xi1>, vector<8x128xf32>
    %c8_i32_115 = arith.constant 8 : i32
    %c0_116 = arith.constant 0 : index
    %c0_117 = arith.constant 0 : index
    %400 = vector.load %arg11[%c0_116, %c0_117] : memref<8x128xf32, #tpu.memory_space<vmem>>, vector<8x128xf32>
    tpu.vector_store %arg11[%c0_116, %c0_117], %396 {strides = array<i32>} : memref<8x128xf32, #tpu.memory_space<vmem>>, vector<8x128xf32>,
    %c0_118 = arith.constant 0 : index
    %c0_119 = arith.constant 0 : index
    %401 = vector.load %arg12[%c0_118, %c0_119] : memref<8x128xf32, #tpu.memory_space<vmem>>, vector<8x128xf32>
    tpu.vector_store %arg12[%c0_118, %c0_119], %399 {strides = array<i32>} : memref<8x128xf32, #tpu.memory_space<vmem>>, vector<8x128xf32>,
    %c0_i32_120 = arith.constant 0 : i32
    %402 = arith.cmpi eq, %arg1, %c0_i32_120 : i32
    %403 = arith.extui %402 : i1 to i32
    %c0_i32_121 = arith.constant 0 : i32
    %404 = arith.cmpi ne, %403, %c0_i32_121 : i32
    scf.if %404 {
      %405 = arith.truncf %396 : vector<8x128xf32> to vector<8x128xbf16>
      %c0_122 = arith.constant 0 : index
      %c0_123 = arith.constant 0 : index
      %406 = vector.load %arg7[%c0_122, %c0_123] : memref<128x128xbf16, #tpu.memory_space<vmem>>, vector<128x128xbf16>
      %cst_124 = arith.constant dense<0.000000e+00> : vector<8x128xf32>
      %407 = tpu.matmul %405, %406, %cst_124 {dimension_numbers = #tpu.dot_dimension_numbers<[1], [0], [0], [1], [0, 0, 1, 1], [], []>} : vector<8x128xbf16>, vector<128x128xbf16>, vector<8x128xf32> -> vector<8x128xf32>
      %c0_125 = arith.constant 0 : index
      %c0_126 = arith.constant 0 : index
      %408 = vector.load %arg8[%c0_125, %c0_126] : memref<1x128xf32, #tpu.memory_space<vmem>>, vector<1x128xf32>
      %409 = vector.broadcast %408 : vector<1x128xf32> to vector<8x128xf32>
      %410 = arith.addf %407, %409 : vector<8x128xf32>
      %cst_127 = arith.constant dense<0xFF800000> : vector<8xf32>
      %411 = vector.multi_reduction <maximumf>, %410, %cst_127 [1] : vector<8x128xf32> to vector<8xf32>
      %412 = vector.shape_cast %411 : vector<8xf32> to vector<8x1xf32>
      %413 = vector.broadcast %412 : vector<8x1xf32> to vector<8x128xf32>
      %414 = arith.subf %410, %413 : vector<8x128xf32>
      %415 = math.exp %414 : vector<8x128xf32>
      %cst_128 = arith.constant dense<0.000000e+00> : vector<8xf32>
      %416 = vector.multi_reduction <add>, %415, %cst_128 [1] : vector<8x128xf32> to vector<8xf32>
      %417 = vector.shape_cast %416 : vector<8xf32> to vector<8x1xf32>
      %418 = math.log %417 : vector<8x1xf32>
      %419 = vector.broadcast %418 : vector<8x1xf32> to vector<8x128xf32>
      %420 = arith.subf %414, %419 : vector<8x128xf32>
      %c0_129 = arith.constant 0 : index
      %c0_130 = arith.constant 0 : index
      %421 = vector.load %arg9[%c0_129, %c0_130] : memref<8x128xf32, #tpu.memory_space<vmem>>, vector<8x128xf32>
      tpu.vector_store %arg9[%c0_129, %c0_130], %420 {strides = array<i32>} : memref<8x128xf32, #tpu.memory_space<vmem>>, vector<8x128xf32>,
    } else {
    }
    return
  }
  func.func @transform_0(%arg0: i32, %arg1: i32) -> (i32, i32, i32) {
    %c0_i32 = arith.constant 0 : i32
    %c0_i32_0 = arith.constant 0 : i32
    return %arg1, %arg0, %c0_i32 : i32, i32, i32
  }
  func.func @transform_1(%arg0: i32, %arg1: i32) -> (i32, i32) {
    %c0_i32 = arith.constant 0 : i32
    %c0_i32_0 = arith.constant 0 : i32
    return %arg0, %c0_i32 : i32, i32
  }
  func.func @transform_2(%arg0: i32, %arg1: i32) -> (i32, i32) {
    %c0_i32 = arith.constant 0 : i32
    %c0_i32_0 = arith.constant 0 : i32
    %c0_i32_1 = arith.constant 0 : i32
    return %c0_i32, %c0_i32_0 : i32, i32
  }
  func.func @transform_3(%arg0: i32, %arg1: i32) -> (i32, i32) {
    %c0_i32 = arith.constant 0 : i32
    %c0_i32_0 = arith.constant 0 : i32
    %c0_i32_1 = arith.constant 0 : i32
    return %c0_i32, %c0_i32_0 : i32, i32
  }
  func.func @transform_4(%arg0: i32, %arg1: i32) -> (i32, i32) {
    %c0_i32 = arith.constant 0 : i32
    %c0_i32_0 = arith.constant 0 : i32
    %c0_i32_1 = arith.constant 0 : i32
    return %c0_i32, %c0_i32_0 : i32, i32
  }
  func.func @transform_5(%arg0: i32, %arg1: i32) -> (i32, i32) {
    %c0_i32 = arith.constant 0 : i32
    %c0_i32_0 = arith.constant 0 : i32
    %c0_i32_1 = arith.constant 0 : i32
    return %c0_i32, %c0_i32_0 : i32, i32
  }
  func.func @transform_6(%arg0: i32, %arg1: i32) -> (i32, i32) {
    %c0_i32 = arith.constant 0 : i32
    %c0_i32_0 = arith.constant 0 : i32
    %c0_i32_1 = arith.constant 0 : i32
    return %c0_i32, %c0_i32_0 : i32, i32
  }
  func.func @transform_7(%arg0: i32, %arg1: i32) -> (i32, i32) {
    %c0_i32 = arith.constant 0 : i32
    %c0_i32_0 = arith.constant 0 : i32
    return %arg0, %c0_i32 : i32, i32
  }
}

</mosaic_0001>

<bundles_post_ra>
// kernel: tpu_custom_call.1
= control target key start
LH: loop header
LB: loop body
LE: loop exit
PB: predicated region body
PF: predicated region fallthrough
CT: control target
= control target key end

     0   :  { %12 = vsyncpa [#allocation6], 0  ;;  %s2870_s0 = inlined_call_operand.hbm [shape: f32[8,8,32], index: 0, kind: input, shape index: {}]   ;;  %s2871_s1 = inlined_call_operand.vmem [shape: s32[8,1], index: 1, kind: input, shape index: {}]   ;;  %s2872_s2 = inlined_call_operand.hbm [shape: bf16[32,512], index: 2, kind: input, shape index: {}]   ;;  %s2873_s3 = inlined_call_operand.hbm [shape: bf16[128,512], index: 3, kind: input, shape index: {}]   ;;  %s2874_s4 = inlined_call_operand.vmem [shape: f32[1,512], index: 4, kind: input, shape index: {}]   ;;  %s2875_s5 = inlined_call_operand.hbm [shape: bf16[128,128], index: 5, kind: input, shape index: {}]   ;;  %s2876_s6 = inlined_call_operand.vmem [shape: f32[1,128], index: 6, kind: input, shape index: {}]   ;;  %s2877_s7 = inlined_call_operand.hbm [shape: f32[8,128], index: 7, kind: output, shape index: {}]  }
   0x1   :  { %13 = vsyncpa [#allocation9], 0 }
   0x2   :  { %14 = vsyncpa [#allocation12], 0 }
   0x3   :  { %15 = vsyncpa [#allocation7], 0  ;;  %s2104_s24 = smov [#allocation8]   ;;  %s1986_s28 = scalar_lea.hbm %s2872_s2, 1024 }
   0x4   :  { %s35_s25 = sshll.u32 %s2104_s24, 4  ;;  %p1987_p0 = scmp.ne.s32.totalorder %s2872_s2, %s1986_s28  ;;  %s36_s25 = int_to_ptr.vmem [resolvable:$true] %s35_s25 }
   0x5   :  { %p1990_p1 = scmp.lt.u32.totalorder %s1986_s28, %s2872_s2 }
   0x7   :  { %p1992_p2 = pnand %p1990_p1, %p1987_p0 }
   0x9   :  { %1995 = shalt.err (!%p1992_p2)
}
   0xa   :  { %s1996_s10 = scalar_lea.vmem %s36_s25, 1024  ;;  %p2001_p4 = scmp.lt.s32.totalorder %s36_s25, %s36_s25 }
   0xb   :  { %p1997_p3 = scmp.ne.s32.totalorder %s36_s25, %s1996_s10  ;;  %p2002_p5 = scmp.lt.s32.totalorder %s1996_s10, %s1996_s10 }
   0xd   :  { %p2003_p6 = por %p2002_p5, %p2001_p4 }
   0xf   :  { %p2004_p7 = pnand %p2003_p6, %p1997_p3 }
  0x11   :  { %2007 = shalt.err (!%p2004_p7)
}
  0x12   :  { %s2105_s11 = smov 256   ;;  %s2106_s12 = smov 16  }
  0x13   :  { %41 = dma.hbm_to_vmem [thread:$0]  %s2872_s2, 1024, %s36_s25, [#allocation9], %s2105_s11, %s2105_s11, %s2106_s12  }
  0x14   :  { %s2107_s15 = smov [#allocation5]   ;;  %s2008_s19 = scalar_lea.hbm %s2870_s0, 1024 }
  0x15   :  { %s21_s16 = sshll.u32 %s2107_s15, 4  ;;  %p2009_p8 = scmp.ne.s32.totalorder %s2870_s0, %s2008_s19  ;;  %s22_s16 = int_to_ptr.vmem [resolvable:$true] %s21_s16 }
  0x16   :  { %p2012_p9 = scmp.lt.u32.totalorder %s2008_s19, %s2870_s0 }
  0x18   :  { %p2014_p10 = pnand %p2012_p9, %p2009_p8 }
  0x1a   :  { %2017 = shalt.err (!%p2014_p10)
}
  0x1b   :  { %s2018_s24 = scalar_lea.vmem %s22_s16, 1024  ;;  %p2023_p12 = scmp.lt.s32.totalorder %s22_s16, %s22_s16 }
  0x1c   :  { %p2019_p11 = scmp.ne.s32.totalorder %s22_s16, %s2018_s24  ;;  %p2024_p13 = scmp.lt.s32.totalorder %s2018_s24, %s2018_s24 }
  0x1e   :  { %p2025_p0 = por %p2024_p13, %p2023_p12 }
  0x20   :  { %p2026_p1 = pnand %p2025_p0, %p2019_p11 }
  0x22   :  { %2029 = shalt.err (!%p2026_p1)
}
  0x23   :  { %s2108_s2 = smov 128   ;;  %s2109_s25 = smov 8  }
  0x24   :  { %27 = dma.hbm_to_vmem [thread:$0]  %s2870_s0, 1024, %s22_s16, [#allocation6], %s2108_s2, %s2108_s2, %s2109_s25  }
  0x25   :  { %s2110_s28 = smov [#allocation10]   ;;  %s2111_s30 = smov [#allocation11]  }
  0x26   :  { %s47_s29 = sshll.u32 %s2110_s28, 4  ;;  %s61_s8 = sshll.u32 %s2111_s30, 4  ;;  %s48_s29 = int_to_ptr.vmem [resolvable:$true] %s47_s29  ;;  %s2186_s8 = int_to_ptr.vmem [resolvable:$true] %s61_s8 }
  0x27   :  { %s2030_s13 = scalar_lea.hbm %s2873_s3, 4096 }
  0x28   :  { %p2031_p2 = scmp.ne.s32.totalorder %s2873_s3, %s2030_s13  ;;  %p2034_p3 = scmp.lt.u32.totalorder %s2030_s13, %s2873_s3 }
  0x2a   :  { %p2036_p4 = pnand %p2034_p3, %p2031_p2 }
  0x2c   :  { %2039 = shalt.err (!%p2036_p4)
}
  0x2d   :  { %s2040_s0 = scalar_lea.vmem %s48_s29, 4096  ;;  %p2045_p6 = scmp.lt.s32.totalorder %s48_s29, %s48_s29 }
  0x2e   :  { %p2041_p5 = scmp.ne.s32.totalorder %s48_s29, %s2040_s0  ;;  %p2046_p7 = scmp.lt.s32.totalorder %s2040_s0, %s2040_s0 }
  0x30   :  { %p2047_p8 = por %p2046_p7, %p2045_p6 }
  0x32   :  { %p2048_p9 = pnand %p2047_p8, %p2041_p5 }
  0x34   :  { %2051 = shalt.err (!%p2048_p9)
}
  0x35   :  { %53 = dma.hbm_to_vmem [thread:$0]  %s2873_s3, 4096, %s48_s29, [#allocation9], %s2105_s11, %s2105_s11, %s2106_s12  }
  0x36   :  { %s2052_s22 = scalar_lea.hbm %s2875_s5, 1024 }
  0x37   :  { %p2053_p10 = scmp.ne.s32.totalorder %s2875_s5, %s2052_s22  ;;  %p2056_p11 = scmp.lt.u32.totalorder %s2052_s22, %s2875_s5 }
  0x39   :  { %p2058_p12 = pnand %p2056_p11, %p2053_p10 }
  0x3b   :  { %2061 = shalt.err (!%p2058_p12)
}
  0x3c   :  { %s2062_s26 = scalar_lea.vmem %s2186_s8, 1024  ;;  %p2067_p0 = scmp.lt.s32.totalorder %s2186_s8, %s2186_s8 }
  0x3d   :  { %p2063_p13 = scmp.ne.s32.totalorder %s2186_s8, %s2062_s26  ;;  %p2068_p1 = scmp.lt.s32.totalorder %s2062_s26, %s2062_s26 }
  0x3f   :  { %p2069_p2 = por %p2068_p1, %p2067_p0 }
  0x41   :  { %p2070_p3 = pnand %p2069_p2, %p2063_p13 }
  0x43   :  { %2073 = shalt.err (!%p2070_p3)
}
  0x44   :  { %s2112_s3 = smov 64   ;;  %s2113_s11 = smov 4  }
  0x45   :  { %67 = dma.hbm_to_vmem [thread:$0]  %s2875_s5, 1024, %s2186_s8, [#allocation12], %s2112_s3, %s2112_s3, %s2113_s11  }
  0x46   :  { %2096 = dma.done.wait [#allocation6], 1024  }
  0x47   :  { %2097 = vsyncadd [#allocation6], 4294966272 }
  0x48   :  { %2098 = dma.done.wait [#allocation9], 5120  }
  0x49   :  { %2099 = vsyncadd [#allocation9], 4294962176 }
  0x4a   :  { %2100 = dma.done.wait [#allocation12], 1024  }
  0x4b   :  { %2101 = vsyncadd [#allocation12], 4294966272  ;;  %v2878_v0 = vmov 0   ;;  %v1802_v1 = vld [vmem:[#allocation8 + $0x4] ss:$16 sps:$4 sm:$0xff]   ;;  %v90_v10 = vld [vmem:[#allocation5 + $0x8] sm:$0xff] }
  0x4c   :  { %194 = vmatprep.mubr.bf16.mxu0 %v2878_v0  ;;  %267 = vmatprep.mubr.bf16.mxu1 %v2878_v0  ;;  %v1804_v2 = vld [vmem:[#allocation8 + $0xc] ss:$16 sps:$4 sm:$0xff]   ;;  %v1806_v3 = vld [vmem:[#allocation8] ss:$16 sps:$4 sm:$0xff]   ;;  %v1807_v4 = vld [vmem:[#allocation8 + $0x8] ss:$16 sps:$4 sm:$0xff]  }
  0x4d   :  { %1800 = vset.pattern.permute.xlu0 %v2878_v0  ;;  %1801 = vset.pattern.permute.xlu1 %v2878_v0  ;;  %v1808_v5 = vld [vmem:[#allocation8 + $0x24] ss:$16 sps:$4 sm:$0xff]   ;;  %v1810_v6 = vld [vmem:[#allocation8 + $0x2c] ss:$16 sps:$4 sm:$0xff]   ;;  %v1812_v7 = vld [vmem:[#allocation8 + $0x20] ss:$16 sps:$4 sm:$0xff]  }
  0x4e   :  { %162 = vmatprep.subr.bf16.mxu0 %v1802_v1  ;;  %235 = vmatprep.subr.bf16.mxu1 %v1804_v2  ;;  %v1813_v8 = vld [vmem:[#allocation8 + $0x28] ss:$16 sps:$4 sm:$0xff]   ;;  %v89_v9 = vld [vmem:[#allocation5] sm:$0xff]  ;;  %v2226_v13 = vld [vmem:[#allocation10 + $0xc] ss:$16 sps:$4 sm:$0xff]   ;;  %vm149_vm0 = vcmask 261120  }
  0x4f   :  { %163 = vmatpush1.bf16.msra.mxu0 %v1806_v3  ;;  %236 = vmatpush1.bf16.msra.mxu1 %v1807_v4  ;;  %v2224_v11 = vld [vmem:[#allocation10 + $0x4] ss:$16 sps:$4 sm:$0xff]   ;;  %v97_v12 = vpack.c.bf16 %v90_v10, %v89_v9  ;;  %v2228_v14 = vld [vmem:[#allocation10] ss:$16 sps:$4 sm:$0xff]   ;;  %v2230_v15 = vld [vmem:[#allocation10 + $0x8] ss:$16 sps:$4 sm:$0xff]  }
  0x50   :  { %164 = vmatprep.subr.bf16.mxu0 %v1808_v5  ;;  %237 = vmatprep.subr.bf16.mxu1 %v1810_v6  ;;  %v2234_v16 = vld [vmem:[#allocation10 + $0x24] ss:$16 sps:$4 sm:$0xff]   ;;  %v2236_v17 = vld [vmem:[#allocation10 + $0x2c] ss:$16 sps:$4 sm:$0xff]   ;;  %v2238_v18 = vld [vmem:[#allocation10 + $0x20] ss:$16 sps:$4 sm:$0xff]  }
  0x51   :  { %v2242_v19 = vld [vmem:[#allocation10 + $0x28] ss:$16 sps:$4 sm:$0xff]   ;;  %v91_v20 = vld [vmem:[#allocation5 + $0x10] sm:$0xff]  ;;  %v2250_v23 = vld [vmem:[#allocation10 + $0x4c] ss:$16 sps:$4 sm:$0xff]   ;;  %v2115_v57 = vmov 0.0|0.0  }
  0x52   :  { %v92_v21 = vld [vmem:[#allocation5 + $0x18] sm:$0xff]  ;;  %v2246_v22 = vld [vmem:[#allocation10 + $0x44] ss:$16 sps:$4 sm:$0xff]   ;;  %v2256_v25 = vld [vmem:[#allocation10 + $0x40] ss:$16 sps:$4 sm:$0xff]   ;;  %s2118_s8 = smov [#allocation13]  }
  0x53   :  { %165 = vmatpush1.bf16.msra.mxu0 %v1812_v7  ;;  %238 = vmatpush1.bf16.msra.mxu1 %v1813_v8  ;;  %v98_v24 = vpack.c.bf16 %v92_v21, %v91_v20  ;;  %v2258_v26 = vld [vmem:[#allocation10 + $0x48] ss:$16 sps:$4 sm:$0xff]   ;;  %v2262_v27 = vld [vmem:[#allocation10 + $0x64] ss:$16 sps:$4 sm:$0xff]   ;;  %v2264_v28 = vld [vmem:[#allocation10 + $0x6c] ss:$16 sps:$4 sm:$0xff]  }
  0x54   :  { %542 = vmatprep.subr.bf16.mxu0 %v2224_v11  ;;  %583 = vmatprep.subr.bf16.mxu1 %v2226_v13  ;;  %v2266_v29 = vld [vmem:[#allocation10 + $0x60] ss:$16 sps:$4 sm:$0xff]   ;;  %v2268_v30 = vld [vmem:[#allocation10 + $0x68] ss:$16 sps:$4 sm:$0xff]   ;;  %v2274_v33 = vld [vmem:[#allocation10 + $0x84] ss:$16 sps:$4 sm:$0xff]  }
  0x55   :  { %v93_v31 = vld [vmem:[#allocation5 + $0x20] sm:$0xff]  ;;  %v94_v32 = vld [vmem:[#allocation5 + $0x28] sm:$0xff]  ;;  %v95_v42 = vld [vmem:[#allocation5 + $0x30] sm:$0xff]  ;;  %s1682_s9 = sshll.u32 %s2118_s8, 4  ;;  %s1683_s9 = int_to_ptr.vmem [resolvable:$true] %s1682_s9 }
  0x56   :  { %1701 = vmatmul.mubr.msk.bf16.vlgmr.msra.gmra.mrb[0].mxu0 %vm149_vm0, %v97_v12  ;;  %1705 = vmatmul.mubr.msk.bf16.vlgmr.msra.gmra.mrb[0].mxu1 %vm149_vm0, %v97_v12  ;;  %v2278_v34 = vld [vmem:[#allocation10 + $0x8c] ss:$16 sps:$4 sm:$0xff]   ;;  %v99_v35 = vpack.c.bf16 %v94_v32, %v93_v31  ;;  %v2282_v36 = vld [vmem:[#allocation10 + $0x80] ss:$16 sps:$4 sm:$0xff]   ;;  %v2284_v37 = vld [vmem:[#allocation10 + $0x88] ss:$16 sps:$4 sm:$0xff]   ;;  %p2079_p5 = scmp.lt.s32.totalorder %s1683_s9, %s1683_s9 }
  0x57   :  { %543 = vmatpush1.bf16.msra.mxu0 %v2228_v14  ;;  %584 = vmatpush1.bf16.msra.mxu1 %v2230_v15  ;;  %v2288_v38 = vld [vmem:[#allocation10 + $0xa4] ss:$16 sps:$4 sm:$0xff]   ;;  %v2292_v39 = vld [vmem:[#allocation10 + $0xac] ss:$16 sps:$4 sm:$0xff]   ;;  %v2294_v40 = vld [vmem:[#allocation10 + $0xa0] ss:$16 sps:$4 sm:$0xff]  }
  0x58   :  { %544 = vmatprep.subr.bf16.mxu0 %v2234_v16  ;;  %585 = vmatprep.subr.bf16.mxu1 %v2236_v17  ;;  %v2296_v41 = vld [vmem:[#allocation10 + $0xa8] ss:$16 sps:$4 sm:$0xff]   ;;  %v2302_v44 = vld [vmem:[#allocation10 + $0xc4] ss:$16 sps:$4 sm:$0xff]   ;;  %v2306_v45 = vld [vmem:[#allocation10 + $0xcc] ss:$16 sps:$4 sm:$0xff]  }
  0x59   :  { %204 = vmatprep.mubr.bf16.mxu0 %v2878_v0  ;;  %277 = vmatprep.mubr.bf16.mxu1 %v2878_v0  ;;  %v96_v43 = vld [vmem:[#allocation5 + $0x38] sm:$0xff]  ;;  %v2311_v46 = vld [vmem:[%s2871_s1] sm:$0xff] }
  0x5a   :  { %v2315_v47 = vld [vmem:[#allocation10 + $0xc0] ss:$16 sps:$4 sm:$0xff]   ;;  %v2317_v48 = vld [vmem:[#allocation10 + $0xc8] ss:$16 sps:$4 sm:$0xff]   ;;  %vm672_vm1 = vcmp.gt.s32.totalorder %v2311_v46, 0  ;;  %v100_v49 = vpack.c.bf16 %v96_v43, %v95_v42  ;;  %vm796_vm2 = vcmp.gt.s32.totalorder %v2311_v46, 1 }
  0x5b   :  { %545 = vmatpush1.bf16.msra.mxu0 %v2238_v18  ;;  %586 = vmatpush1.bf16.msra.mxu1 %v2242_v19  ;;  %v2320_v50 = vld [vmem:[#allocation10 + $0xe4] ss:$16 sps:$4 sm:$0xff]   ;;  %v2322_v51 = vld [vmem:[#allocation10 + $0xec] ss:$16 sps:$4 sm:$0xff]   ;;  %v673_v52 = vsel %vm672_vm1, 1, %v2878_v0  ;;  %v797_v55 = vsel %vm796_vm2, 1, %v2878_v0 }
  0x5c   :  { %546 = vmatprep.subr.bf16.mxu0 %v2246_v22  ;;  %587 = vmatprep.subr.bf16.mxu1 %v2250_v23  ;;  %v2330_v53 = vld [vmem:[#allocation10 + $0xe0] ss:$16 sps:$4 sm:$0xff]   ;;  %v2336_v54 = vld [vmem:[#allocation10 + $0xe8] ss:$16 sps:$4 sm:$0xff]   ;;  %vm1168_vm3 = vcmp.gt.s32.totalorder %v2311_v46, 4  ;;  %vm1416_vm4 = vcmp.gt.s32.totalorder %v2311_v46, 6 }
  0x5d   :  { %675 = vperm.xlu0 %1800, %v673_v52   ;;  %v1169_v56 = vsel %vm1168_vm3, 1, %v2878_v0  ;;  %v1417_v58 = vsel %vm1416_vm4, 1, %v2878_v0  ;;  %vm920_vm7 = vcmp.gt.s32.totalorder %v2311_v46, 2  ;;  %vm1044_vm8 = vcmp.gt.s32.totalorder %v2311_v46, 3 }
  0x5e   :  { %1702 = vmatmul.mubr.msk.bf16.gmra.mrb[4].mxu0 %vm149_vm0, %v98_v24  ;;  %1706 = vmatmul.mubr.msk.bf16.gmra.mrb[4].mxu1 %vm149_vm0, %v98_v24  ;;  %vm1292_vm9 = vcmp.gt.s32.totalorder %v2311_v46, 5  ;;  %vm1540_vm10 = vcmp.gt.s32.totalorder %v2311_v46, 7  ;;  %vm2117_vm1 = vmmov 0  }
  0x5f   :  { %547 = vmatpush1.bf16.msra.mxu0 %v2256_v25  ;;  %588 = vmatpush1.bf16.msra.mxu1 %v2258_v26 }
  0x60   :  { %548 = vmatprep.subr.bf16.mxu0 %v2262_v27  ;;  %589 = vmatprep.subr.bf16.mxu1 %v2264_v28 }
  0x61   :  { %214 = vmatprep.mubr.bf16.mxu0 %v2878_v0  ;;  %287 = vmatprep.mubr.bf16.mxu1 %v2878_v0 }
  0x62   :  { %799 = vperm.xlu0 %1800, %v797_v55  }
  0x63   :  { %549 = vmatpush1.bf16.msra.mxu0 %v2266_v29  ;;  %590 = vmatpush1.bf16.msra.mxu1 %v2268_v30 }
  0x64   :  { %550 = vmatprep.subr.bf16.mxu0 %v2274_v33  ;;  %591 = vmatprep.subr.bf16.mxu1 %v2278_v34 }
  0x66   :  { %1703 = vmatmul.mubr.msk.bf16.gmra.mrb[8].mxu0 %vm149_vm0, %v99_v35  ;;  %1707 = vmatmul.mubr.msk.bf16.gmra.mrb[8].mxu1 %vm149_vm0, %v99_v35 }
  0x67   :  { %551 = vmatpush1.bf16.msra.mxu0 %v2282_v36  ;;  %592 = vmatpush1.bf16.msra.mxu1 %v2284_v37 }
  0x68   :  { %552 = vmatprep.subr.bf16.mxu0 %v2288_v38  ;;  %593 = vmatprep.subr.bf16.mxu1 %v2292_v39 }
  0x69   :  { %224 = vmatprep.mubr.bf16.mxu0 %v2878_v0  ;;  %297 = vmatprep.mubr.bf16.mxu1 %v2878_v0 }
  0x6a   :  { %1171 = vperm.xlu0 %1800, %v1169_v56  }
  0x6b   :  { %553 = vmatpush1.bf16.msra.mxu0 %v2294_v40  ;;  %594 = vmatpush1.bf16.msra.mxu1 %v2296_v41 }
  0x6c   :  { %554 = vmatprep.subr.bf16.mxu0 %v2302_v44  ;;  %595 = vmatprep.subr.bf16.mxu1 %v2306_v45 }
  0x6e   :  { %1704 = vmatmul.mubr.msk.bf16.gmra.mrb[12].mxu0 %vm149_vm0, %v100_v49  ;;  %1708 = vmatmul.mubr.msk.bf16.gmra.mrb[12].mxu1 %vm149_vm0, %v100_v49  ;;  %v629_v49 = vlaneseq }
  0x6f   :  { %555 = vmatpush1.bf16.msra.mxu0 %v2315_v47  ;;  %596 = vmatpush1.bf16.msra.mxu1 %v2317_v48 }
  0x70   :  { %556 = vmatprep.subr.bf16.mxu0 %v2320_v50  ;;  %597 = vmatprep.subr.bf16.mxu1 %v2322_v51  ;;  %v630_v52 = vshrl.u32 %v629_v49, 7  ;;  %v372_v49 = vld [vmem:[%s2874_s4] sm:$0xf] }
  0x71   :  { %574 = vmatprep.mubr.bf16.mxu0 %v2878_v0  ;;  %615 = vmatprep.mubr.bf16.mxu1 %v2878_v0 }
  0x72   :  { %1419 = vperm.xlu0 %1800, %v1417_v58  }
  0x73   :  { %557 = vmatpush1.bf16.msra.mxu0 %v2330_v53  ;;  %598 = vmatpush1.bf16.msra.mxu1 %v2336_v54 }
  0x74   :  { %686 = vmatprep.subr.bf16.mxu0 %v2224_v11  ;;  %727 = vmatprep.subr.bf16.mxu1 %v2226_v13 }
  0x76   :  { %575 = vmatmul.mubr.bf16.vlgmr.msra.gmra.mrb[16].mxu0 %v2115_v57  ;;  %616 = vmatmul.mubr.bf16.vlgmr.msra.gmra.mrb[16].mxu1 %v2115_v57 }
  0x77   :  { %687 = vmatpush1.bf16.msra.mxu0 %v2228_v14  ;;  %728 = vmatpush1.bf16.msra.mxu1 %v2230_v15 }
  0x78   :  { %688 = vmatprep.subr.bf16.mxu0 %v2234_v16  ;;  %729 = vmatprep.subr.bf16.mxu1 %v2236_v17 }
  0x79   :  { %718 = vmatprep.mubr.bf16.mxu0 %v2878_v0  ;;  %759 = vmatprep.mubr.bf16.mxu1 %v2878_v0 }
  0x7b   :  { %689 = vmatpush1.bf16.msra.mxu0 %v2238_v18  ;;  %730 = vmatpush1.bf16.msra.mxu1 %v2242_v19 }
  0x7c   :  { %690 = vmatprep.subr.bf16.mxu0 %v2246_v22  ;;  %731 = vmatprep.subr.bf16.mxu1 %v2250_v23 }
  0x7f   :  { %691 = vmatpush1.bf16.msra.mxu0 %v2256_v25  ;;  %732 = vmatpush1.bf16.msra.mxu1 %v2258_v26 }
  0x80   :  { %692 = vmatprep.subr.bf16.mxu0 %v2262_v27  ;;  %733 = vmatprep.subr.bf16.mxu1 %v2264_v28 }
  0x83   :  { %693 = vmatpush1.bf16.msra.mxu0 %v2266_v29  ;;  %734 = vmatpush1.bf16.msra.mxu1 %v2268_v30 }
  0x84   :  { %694 = vmatprep.subr.bf16.mxu0 %v2274_v33  ;;  %735 = vmatprep.subr.bf16.mxu1 %v2278_v34 }
  0x87   :  { %695 = vmatpush1.bf16.msra.mxu0 %v2282_v36  ;;  %736 = vmatpush1.bf16.msra.mxu1 %v2284_v37 }
  0x88   :  { %696 = vmatprep.subr.bf16.mxu0 %v2288_v38  ;;  %737 = vmatprep.subr.bf16.mxu1 %v2292_v39 }
  0x8b   :  { %697 = vmatpush1.bf16.msra.mxu0 %v2294_v40  ;;  %738 = vmatpush1.bf16.msra.mxu1 %v2296_v41 }
  0x8c   :  { %698 = vmatprep.subr.bf16.mxu0 %v2302_v44  ;;  %739 = vmatprep.subr.bf16.mxu1 %v2306_v45 }
  0x8f   :  { %699 = vmatpush1.bf16.msra.mxu0 %v2315_v47  ;;  %740 = vmatpush1.bf16.msra.mxu1 %v2317_v48 }
  0x90   :  { %700 = vmatprep.subr.bf16.mxu0 %v2320_v50  ;;  %741 = vmatprep.subr.bf16.mxu1 %v2322_v51 }
  0x93   :  { %701 = vmatpush1.bf16.msra.mxu0 %v2330_v53  ;;  %742 = vmatpush1.bf16.msra.mxu1 %v2336_v54 }
  0x94   :  { %810 = vmatprep.subr.bf16.mxu0 %v2224_v11  ;;  %851 = vmatprep.subr.bf16.mxu1 %v2226_v13 }
 0x129   :  { %v196_v59 = vpop.f32.mrb[0].mxu0  ;;  %v269_v60 = vpop.f32.mrb[0].mxu1 }
 0x12a   :  { %v198_v61 = vpop.f32.mrb[1].mxu0  ;;  %v271_v62 = vpop.f32.mrb[1].mxu1 }
 0x12b   :  { %v2385_v63 = vpop.f32.mrb[2].mxu0  ;;  %v2387_v1 = vpop.f32.mrb[2].mxu1 }
 0x12c   :  { %v2389_v2 = vpop.f32.mrb[3].mxu0  ;;  %v2391_v3 = vpop.f32.mrb[3].mxu1 }
 0x131   :  { %v2393_v4 = vpop.f32.mrb[4].mxu0  ;;  %v2395_v5 = vpop.f32.mrb[4].mxu1 }
 0x132   :  { %2880 = vst [vmem:[#allocation18_spill] sm:$0xff] %v2393_v4  ;;  %2881 = vst [vmem:[#allocation19_spill] sm:$0xff] %v2395_v5  ;;  %v2397_v6 = vpop.f32.mrb[5].mxu0  ;;  %v2399_v7 = vpop.f32.mrb[5].mxu1 }
 0x133   :  { %2882 = vst [vmem:[#allocation20_spill] sm:$0xff] %v2397_v6  ;;  %2883 = vst [vmem:[#allocation21_spill] sm:$0xff] %v2399_v7  ;;  %v2401_v8 = vpop.f32.mrb[6].mxu0  ;;  %v2403_v9 = vpop.f32.mrb[6].mxu1  ;;  %v643_v7 = vsub.s32 3, %v630_v52 }
 0x134   :  { %2884 = vst [vmem:[#allocation22_spill] sm:$0xff] %v2401_v8  ;;  %2885 = vst [vmem:[#allocation23_spill] sm:$0xff] %v2403_v9  ;;  %v2405_v10 = vpop.f32.mrb[7].mxu0  ;;  %v2407_v12 = vpop.f32.mrb[7].mxu1 }
 0x135   :  { %2886 = vst [vmem:[#allocation24_spill] sm:$0xff] %v2405_v10  ;;  %2887 = vst [vmem:[#allocation25_spill] sm:$0xff] %v2407_v12 }
 0x139   :  { %v2409_v20 = vpop.f32.mrb[8].mxu0  ;;  %v2411_v21 = vpop.f32.mrb[8].mxu1 }
 0x13a   :  { %2888 = vst [vmem:[#allocation26_spill] sm:$0xff] %v2409_v20  ;;  %2889 = vst [vmem:[#allocation27_spill] sm:$0xff] %v2411_v21  ;;  %v2413_v24 = vpop.f32.mrb[9].mxu0  ;;  %v2415_v31 = vpop.f32.mrb[9].mxu1 }
 0x13b   :  { %2890 = vst [vmem:[#allocation28_spill] sm:$0xff] %v2413_v24  ;;  %2891 = vst [vmem:[#allocation29_spill] sm:$0xff] %v2415_v31  ;;  %v2417_v32 = vpop.f32.mrb[10].mxu0  ;;  %v2419_v35 = vpop.f32.mrb[10].mxu1 }
 0x13c   :  { %2892 = vst [vmem:[#allocation30_spill] sm:$0xff] %v2417_v32  ;;  %2893 = vst [vmem:[#allocation31_spill] sm:$0xff] %v2419_v35  ;;  %v2421_v42 = vpop.f32.mrb[11].mxu0  ;;  %v2423_v43 = vpop.f32.mrb[11].mxu1 }
 0x13d   :  { %2894 = vst [vmem:[#allocation32_spill] sm:$0xff] %v2421_v42  ;;  %2895 = vst [vmem:[#allocation33_spill] sm:$0xff] %v2423_v43  ;;  %v631_v42 = vsub.s32 0, %v630_v52 }
 0x13f   :  { %v2444_v43 = vrot.slane %v372_v49, %v631_v42 }
 0x141   :  { %v2425_v55 = vpop.f32.mrb[12].mxu0  ;;  %v2427_v56 = vpop.f32.mrb[12].mxu1 }
 0x142   :  { %2896 = vst [vmem:[#allocation34_spill] sm:$0xff] %v2425_v55  ;;  %2897 = vst [vmem:[#allocation35_spill] sm:$0xff] %v2427_v56  ;;  %v2429_v57 = vpop.f32.mrb[13].mxu0  ;;  %v2431_v58 = vpop.f32.mrb[13].mxu1  ;;  %v635_v55 = vsub.s32 1, %v630_v52  ;;  %v639_v56 = vsub.s32 2, %v630_v52 }
 0x143   :  { %2898 = vst [vmem:[#allocation36_spill] sm:$0xff] %v2429_v57  ;;  %2899 = vst [vmem:[#allocation37_spill] sm:$0xff] %v2431_v58  ;;  %v2433_v0 = vpop.f32.mrb[14].mxu0  ;;  %v2435_v31 = vpop.f32.mrb[14].mxu1 }
 0x144   :  { %2900 = vst [vmem:[#allocation38_spill] sm:$0xff] %v2433_v0  ;;  %2901 = vst [vmem:[#allocation39_spill] sm:$0xff] %v2435_v31  ;;  %v2437_v32 = vpop.f32.mrb[15].mxu0  ;;  %v2439_v35 = vpop.f32.mrb[15].mxu1  ;;  %v2446_v58 = vrot.slane %v372_v49, %v635_v55  ;;  %v2449_v8 = vrot.slane %v372_v49, %v639_v56 }
 0x145   :  { %2902 = vst [vmem:[#allocation40_spill] sm:$0xff] %v2437_v32  ;;  %2903 = vst [vmem:[#allocation41_spill] sm:$0xff] %v2439_v35 }
 0x149   :  { %v576_v57 = vpop.f32.mrb[16].mxu0  ;;  %v617_v24 = vpop.f32.mrb[16].mxu1 }
 0x14a   :  { %v624_v0 = vadd.f32 %v576_v57, %v196_v59  ;;  %v626_v21 = vadd.f32 %v617_v24, %v269_v60  ;;  %v578_v31 = vpop.f32.mrb[17].mxu0  ;;  %v619_v20 = vpop.f32.mrb[17].mxu1  ;;  %v2453_v60 = vrot.slane %v372_v49, %v643_v7  ;;  %v2904_v49 = vmov 0  }
 0x14b   :  { %v625_v32 = vadd.f32 %v578_v31, %v198_v61  ;;  %v627_v12 = vadd.f32 %v619_v20, %v271_v62  ;;  %v580_v35 = vpop.f32.mrb[18].mxu0  ;;  %v621_v10 = vpop.f32.mrb[18].mxu1 }
 0x14c   :  { %v649_v9 = vadd.f32 %v2444_v43, %v624_v0  ;;  %v581_v42 = vpop.f32.mrb[19].mxu0  ;;  %v622_v6 = vpop.f32.mrb[19].mxu1  ;;  %v651_v59 = vadd.f32 %v2449_v8, %v626_v21 }
 0x14d   :  { %v650_v5 = vadd.f32 %v2446_v58, %v625_v32  ;;  %v652_v61 = vadd.f32 %v2453_v60, %v627_v12  ;;  %v2459_v35 = vpop.permute.xlu0 %675  ;;  %v921_v42 = vsel %vm920_vm7, 1, %v2904_v49 }
 0x14e   :  { %v653_v4 = vmul.f32 0.5, %v649_v9  ;;  %vm677_vm5 = vcmp.eq.s32.totalorder %v2459_v35, 1  ;;  %923 = vperm.xlu1 %1801, %v921_v42  }
 0x14f   :  { %v657_v55 = vmul.f32 0.5, %v650_v5  ;;  %v662_v62 = vmul.f32 0.5, %v652_v61  ;;  %vm1750_vm6 = vmpackc.low %vm677_vm5, %vm677_vm5  ;;  %v1541_v61 = vsel %vm1540_vm10, 1, %v2904_v49 }
 0x150   :  { %1870 = vtanh.f32 %v653_v4 }
 0x151   :  { %1872 = vtanh.f32 %v657_v55  ;;  %v1045_v55 = vsel %vm1044_vm8, 1, %v2904_v49 }
 0x152   :  { %1874 = vtanh.f32 %v651_v59  ;;  %1047 = vperm.xlu1 %1801, %v1045_v55   ;;  %v1293_v59 = vsel %vm1292_vm9, 1, %v2904_v49 }
 0x153   :  { %1876 = vtanh.f32 %v662_v62 }
 0x156   :  { %1295 = vperm.xlu1 %1801, %v1293_v59  }
 0x15a   :  { %v1871_v0 = vpop.eup %1870  ;;  %1543 = vperm.xlu1 %1801, %v1541_v61  }
 0x15b   :  { %v1873_v10 = vpop.eup %1872  ;;  %v655_v20 = vadd.f32 1.0, %v1871_v0 }
 0x15c   :  { %v659_v24 = vadd.f32 1.0, %v1873_v10  ;;  %v1875_v31 = vpop.eup %1874 }
 0x15d   :  { %v656_v6 = vmul.f32 0.5, %v655_v20  ;;  %v1877_v7 = vpop.eup %1876 }
 0x15e   :  { %v660_v32 = vmul.f32 0.5, %v659_v24  ;;  %v664_v21 = vadd.f32 1.0, %v1877_v7 }
 0x15f   :  { %v667_v9 = vmul.f32 %v1875_v31, %v656_v6 }
 0x160   :  { %v666_v5 = vmul.f32 0.0, %v660_v32  ;;  %v665_v12 = vmul.f32 0.5, %v664_v21 }
 0x162   :  { %v2456_v4 = vadd.f32 %v667_v9, %v666_v5 }
 0x164   :  { %1878 = vtanh.f32 %v2456_v4 }
 0x16e   :  { %v1879_v52 = vpop.eup %1878 }
 0x16f   :  { %v2461_v56 = vmul.f32 %v1879_v52, %v665_v12 }
 0x171   :  { %v1751_v57 = vpack.c.bf16 %v2461_v56, %v2461_v56 }
 0x173   :  { %1752 = vmatmul.mubr.msk.bf16.vlgmr.msra.gmra.mrb[20].mxu0 %vm1750_vm6, %v1751_v57  ;;  %1755 = vmatmul.mubr.msk.bf16.vlgmr.msra.gmra.mrb[20].mxu1 %vm1750_vm6, %v1751_v57 }
 0x174   :  { %811 = vmatpush1.bf16.msra.mxu0 %v2228_v14  ;;  %852 = vmatpush1.bf16.msra.mxu1 %v2230_v15 }
 0x175   :  { %812 = vmatprep.subr.bf16.mxu0 %v2234_v16  ;;  %853 = vmatprep.subr.bf16.mxu1 %v2236_v17 }
 0x176   :  { %842 = vmatprep.mubr.bf16.mxu0 %v2904_v49  ;;  %883 = vmatprep.mubr.bf16.mxu1 %v2904_v49 }
 0x178   :  { %813 = vmatpush1.bf16.msra.mxu0 %v2238_v18  ;;  %854 = vmatpush1.bf16.msra.mxu1 %v2242_v19 }
 0x179   :  { %814 = vmatprep.subr.bf16.mxu0 %v2246_v22  ;;  %855 = vmatprep.subr.bf16.mxu1 %v2250_v23 }
 0x17c   :  { %815 = vmatpush1.bf16.msra.mxu0 %v2256_v25  ;;  %856 = vmatpush1.bf16.msra.mxu1 %v2258_v26 }
 0x17d   :  { %816 = vmatprep.subr.bf16.mxu0 %v2262_v27  ;;  %857 = vmatprep.subr.bf16.mxu1 %v2264_v28 }
 0x180   :  { %817 = vmatpush1.bf16.msra.mxu0 %v2266_v29  ;;  %858 = vmatpush1.bf16.msra.mxu1 %v2268_v30 }
 0x181   :  { %818 = vmatprep.subr.bf16.mxu0 %v2274_v33  ;;  %859 = vmatprep.subr.bf16.mxu1 %v2278_v34 }
 0x184   :  { %819 = vmatpush1.bf16.msra.mxu0 %v2282_v36  ;;  %860 = vmatpush1.bf16.msra.mxu1 %v2284_v37 }
 0x185   :  { %820 = vmatprep.subr.bf16.mxu0 %v2288_v38  ;;  %861 = vmatprep.subr.bf16.mxu1 %v2292_v39 }
 0x188   :  { %821 = vmatpush1.bf16.msra.mxu0 %v2294_v40  ;;  %862 = vmatpush1.bf16.msra.mxu1 %v2296_v41 }
 0x189   :  { %822 = vmatprep.subr.bf16.mxu0 %v2302_v44  ;;  %863 = vmatprep.subr.bf16.mxu1 %v2306_v45 }
 0x18c   :  { %823 = vmatpush1.bf16.msra.mxu0 %v2315_v47  ;;  %864 = vmatpush1.bf16.msra.mxu1 %v2317_v48 }
 0x18d   :  { %824 = vmatprep.subr.bf16.mxu0 %v2320_v50  ;;  %865 = vmatprep.subr.bf16.mxu1 %v2322_v51 }
 0x190   :  { %825 = vmatpush1.bf16.msra.mxu0 %v2330_v53  ;;  %866 = vmatpush1.bf16.msra.mxu1 %v2336_v54 }
 0x191   :  { %934 = vmatprep.subr.bf16.mxu0 %v2224_v11  ;;  %975 = vmatprep.subr.bf16.mxu1 %v2226_v13 }
 0x246   :  { %v720_v62 = vpop.f32.mrb[20].mxu0  ;;  %v761_v0 = vpop.f32.mrb[20].mxu1 }
 0x247   :  { %v768_v10 = vadd.f32 %v720_v62, %v2385_v63  ;;  %v770_v20 = vadd.f32 %v761_v0, %v2387_v1  ;;  %v722_v24 = vpop.f32.mrb[21].mxu0  ;;  %v763_v6 = vpop.f32.mrb[21].mxu1 }
 0x248   :  { %v769_v31 = vadd.f32 %v722_v24, %v2389_v2  ;;  %v771_v32 = vadd.f32 %v763_v6, %v2391_v3  ;;  %v724_v9 = vpop.f32.mrb[22].mxu0  ;;  %v765_v5 = vpop.f32.mrb[22].mxu1 }
 0x249   :  { %v772_v46 = vadd.f32 %v768_v10, %v2444_v43  ;;  %v725_v7 = vpop.f32.mrb[23].mxu0  ;;  %v766_v21 = vpop.f32.mrb[23].mxu1  ;;  %v774_v63 = vadd.f32 %v770_v20, %v2449_v8  ;;  %v679_v10 = vsel %vm677_vm5, %v2456_v4, 0.0 }
 0x24a   :  { %v773_v12 = vadd.f32 %v769_v31, %v2446_v58  ;;  %v775_v1 = vadd.f32 %v771_v32, %v2453_v60  ;;  %v800_v20 = vpop.permute.xlu0 %799 }
 0x24b   :  { %v776_v52 = vmul.f32 0.5, %v772_v46  ;;  %vm801_vm11 = vcmp.eq.s32.totalorder %v800_v20, 1 }
 0x24c   :  { %v780_v57 = vmul.f32 0.5, %v773_v12  ;;  %v785_v2 = vmul.f32 0.5, %v775_v1  ;;  %v678_v12 = vsel %vm677_vm5, %v2461_v56, 0.0  ;;  %v2906_v1 = vld [vmem:[#allocation19_spill] sm:$0xff] }
 0x24d   :  { %1880 = vtanh.f32 %v776_v52 }
 0x24e   :  { %1882 = vtanh.f32 %v780_v57  ;;  %v2905_v57 = vld [vmem:[#allocation18_spill] sm:$0xff] }
 0x24f   :  { %1884 = vtanh.f32 %v774_v63 }
 0x250   :  { %1886 = vtanh.f32 %v785_v2 }
 0x257   :  { %v1881_v42 = vpop.eup %1880 }
 0x258   :  { %v1883_v3 = vpop.eup %1882  ;;  %v778_v55 = vadd.f32 1.0, %v1881_v42 }
 0x259   :  { %v782_v59 = vadd.f32 1.0, %v1883_v3  ;;  %v1885_v62 = vpop.eup %1884 }
 0x25a   :  { %v779_v61 = vmul.f32 0.5, %v778_v55  ;;  %v1887_v9 = vpop.eup %1886  ;;  %v2907_v55 = vld [vmem:[#allocation20_spill] sm:$0xff] }
 0x25b   :  { %v783_v0 = vmul.f32 0.5, %v782_v59  ;;  %v787_v5 = vadd.f32 1.0, %v1887_v9 }
 0x25c   :  { %v790_v24 = vmul.f32 %v1885_v62, %v779_v61  ;;  %v2908_v61 = vld [vmem:[#allocation21_spill] sm:$0xff] }
 0x25d   :  { %v789_v6 = vmul.f32 %v783_v0, %v679_v10  ;;  %v788_v46 = vmul.f32 0.5, %v787_v5 }
 0x25f   :  { %v791_v31 = vadd.f32 %v790_v24, %v789_v6 }
 0x261   :  { %1888 = vtanh.f32 %v791_v31  ;;  %v2522_v32 = vsel %vm801_vm11, %v791_v31, %v679_v10 }
 0x26b   :  { %v1889_v7 = vpop.eup %1888 }
 0x26c   :  { %v793_v21 = vmul.f32 %v1889_v7, %v788_v46 }
 0x26e   :  { %v2527_v52 = vsel %vm801_vm11, %v793_v21, %v678_v12 }
 0x26f   :  { %v809_v4 = vpack.c.bf16 %v2527_v52, %v2527_v52 }
 0x271   :  { %843 = vmatmul.mubr.bf16.vlgmr.msra.gmra.mrb[24].mxu0 %v809_v4  ;;  %884 = vmatmul.mubr.bf16.vlgmr.msra.gmra.mrb[24].mxu1 %v809_v4 }
 0x272   :  { %935 = vmatpush1.bf16.msra.mxu0 %v2228_v14  ;;  %976 = vmatpush1.bf16.msra.mxu1 %v2230_v15 }
 0x273   :  { %936 = vmatprep.subr.bf16.mxu0 %v2234_v16  ;;  %977 = vmatprep.subr.bf16.mxu1 %v2236_v17 }
 0x274   :  { %966 = vmatprep.mubr.bf16.mxu0 %v2904_v49  ;;  %1007 = vmatprep.mubr.bf16.mxu1 %v2904_v49 }
 0x276   :  { %937 = vmatpush1.bf16.msra.mxu0 %v2238_v18  ;;  %978 = vmatpush1.bf16.msra.mxu1 %v2242_v19 }
 0x277   :  { %938 = vmatprep.subr.bf16.mxu0 %v2246_v22  ;;  %979 = vmatprep.subr.bf16.mxu1 %v2250_v23 }
 0x27a   :  { %939 = vmatpush1.bf16.msra.mxu0 %v2256_v25  ;;  %980 = vmatpush1.bf16.msra.mxu1 %v2258_v26 }
 0x27b   :  { %940 = vmatprep.subr.bf16.mxu0 %v2262_v27  ;;  %981 = vmatprep.subr.bf16.mxu1 %v2264_v28 }
 0x27e   :  { %941 = vmatpush1.bf16.msra.mxu0 %v2266_v29  ;;  %982 = vmatpush1.bf16.msra.mxu1 %v2268_v30 }
 0x27f   :  { %942 = vmatprep.subr.bf16.mxu0 %v2274_v33  ;;  %983 = vmatprep.subr.bf16.mxu1 %v2278_v34 }
 0x282   :  { %943 = vmatpush1.bf16.msra.mxu0 %v2282_v36  ;;  %984 = vmatpush1.bf16.msra.mxu1 %v2284_v37 }
 0x283   :  { %944 = vmatprep.subr.bf16.mxu0 %v2288_v38  ;;  %985 = vmatprep.subr.bf16.mxu1 %v2292_v39 }
 0x286   :  { %945 = vmatpush1.bf16.msra.mxu0 %v2294_v40  ;;  %986 = vmatpush1.bf16.msra.mxu1 %v2296_v41 }
 0x287   :  { %946 = vmatprep.subr.bf16.mxu0 %v2302_v44  ;;  %987 = vmatprep.subr.bf16.mxu1 %v2306_v45 }
 0x28a   :  { %947 = vmatpush1.bf16.msra.mxu0 %v2315_v47  ;;  %988 = vmatpush1.bf16.msra.mxu1 %v2317_v48 }
 0x28b   :  { %948 = vmatprep.subr.bf16.mxu0 %v2320_v50  ;;  %989 = vmatprep.subr.bf16.mxu1 %v2322_v51 }
 0x28e   :  { %949 = vmatpush1.bf16.msra.mxu0 %v2330_v53  ;;  %990 = vmatpush1.bf16.msra.mxu1 %v2336_v54 }
 0x28f   :  { %1058 = vmatprep.subr.bf16.mxu0 %v2224_v11  ;;  %1099 = vmatprep.subr.bf16.mxu1 %v2226_v13 }
 0x344   :  { %v844_v35 = vpop.f32.mrb[24].mxu0  ;;  %v885_v56 = vpop.f32.mrb[24].mxu1 }
 0x345   :  { %v892_v63 = vadd.f32 %v844_v35, %v2905_v57  ;;  %v894_v2 = vadd.f32 %v885_v56, %v2906_v1  ;;  %v846_v42 = vpop.f32.mrb[25].mxu0  ;;  %v887_v3 = vpop.f32.mrb[25].mxu1 }
 0x346   :  { %v893_v59 = vadd.f32 %v846_v42, %v2907_v55  ;;  %v895_v62 = vadd.f32 %v887_v3, %v2908_v61  ;;  %v848_v0 = vpop.f32.mrb[26].mxu0  ;;  %v889_v10 = vpop.f32.mrb[26].mxu1 }
 0x347   :  { %v896_v24 = vadd.f32 %v892_v63, %v2444_v43  ;;  %v849_v6 = vpop.f32.mrb[27].mxu0  ;;  %v890_v20 = vpop.f32.mrb[27].mxu1  ;;  %v898_v46 = vadd.f32 %v894_v2, %v2449_v8 }
 0x348   :  { %v897_v31 = vadd.f32 %v893_v59, %v2446_v58  ;;  %v899_v7 = vadd.f32 %v895_v62, %v2453_v60  ;;  %v924_v42 = vpop.permute.xlu1 %923 }
 0x349   :  { %v900_v9 = vmul.f32 0.5, %v896_v24  ;;  %vm925_vm12 = vcmp.eq.s32.totalorder %v924_v42, 1 }
 0x34a   :  { %v904_v5 = vmul.f32 0.5, %v897_v31  ;;  %v909_v21 = vmul.f32 0.5, %v899_v7 }
 0x34b   :  { %1890 = vtanh.f32 %v900_v9  ;;  %v2912_v9 = vld [vmem:[#allocation25_spill] sm:$0xff] }
 0x34c   :  { %1892 = vtanh.f32 %v904_v5 }
 0x34d   :  { %1894 = vtanh.f32 %v898_v46 }
 0x34e   :  { %1896 = vtanh.f32 %v909_v21 }
 0x355   :  { %v1891_v12 = vpop.eup %1890 }
 0x356   :  { %v1893_v4 = vpop.eup %1892  ;;  %v902_v35 = vadd.f32 1.0, %v1891_v12 }
 0x357   :  { %v906_v56 = vadd.f32 1.0, %v1893_v4  ;;  %v1895_v63 = vpop.eup %1894 }
 0x358   :  { %v903_v57 = vmul.f32 0.5, %v902_v35  ;;  %v1897_v61 = vpop.eup %1896 }
 0x359   :  { %v907_v1 = vmul.f32 0.5, %v906_v56  ;;  %v911_v62 = vadd.f32 1.0, %v1897_v61 }
 0x35a   :  { %v914_v3 = vmul.f32 %v1895_v63, %v903_v57 }
 0x35b   :  { %v913_v55 = vmul.f32 %v907_v1, %v2522_v32  ;;  %v912_v0 = vmul.f32 0.5, %v911_v62 }
 0x35d   :  { %v915_v59 = vadd.f32 %v914_v3, %v913_v55 }
 0x35f   :  { %1898 = vtanh.f32 %v915_v59  ;;  %v2575_v2 = vsel %vm925_vm12, %v915_v59, %v2522_v32 }
 0x369   :  { %v1899_v10 = vpop.eup %1898 }
 0x36a   :  { %v917_v24 = vmul.f32 %v1899_v10, %v912_v0 }
 0x36c   :  { %v2578_v6 = vsel %vm925_vm12, %v917_v24, %v2527_v52  ;;  %v2911_v52 = vld [vmem:[#allocation24_spill] sm:$0xff]  ;;  %v1048_v24 = vpop.permute.xlu1 %1047 }
 0x36d   :  { %v933_v20 = vpack.c.bf16 %v2578_v6, %v2578_v6  ;;  %vm1049_vm13 = vcmp.eq.s32.totalorder %v1048_v24, 1 }
 0x36f   :  { %967 = vmatmul.mubr.bf16.vlgmr.msra.gmra.mrb[28].mxu0 %v933_v20  ;;  %1008 = vmatmul.mubr.bf16.vlgmr.msra.gmra.mrb[28].mxu1 %v933_v20 }
 0x370   :  { %1059 = vmatpush1.bf16.msra.mxu0 %v2228_v14  ;;  %1100 = vmatpush1.bf16.msra.mxu1 %v2230_v15 }
 0x371   :  { %1060 = vmatprep.subr.bf16.mxu0 %v2234_v16  ;;  %1101 = vmatprep.subr.bf16.mxu1 %v2236_v17  ;;  %v2909_v16 = vld [vmem:[#allocation22_spill] sm:$0xff] }
 0x372   :  { %1090 = vmatprep.mubr.bf16.mxu0 %v2904_v49  ;;  %1131 = vmatprep.mubr.bf16.mxu1 %v2904_v49 }
 0x374   :  { %1061 = vmatpush1.bf16.msra.mxu0 %v2238_v18  ;;  %1102 = vmatpush1.bf16.msra.mxu1 %v2242_v19  ;;  %v2910_v18 = vld [vmem:[#allocation23_spill] sm:$0xff] }
 0x375   :  { %1062 = vmatprep.subr.bf16.mxu0 %v2246_v22  ;;  %1103 = vmatprep.subr.bf16.mxu1 %v2250_v23 }
 0x378   :  { %1063 = vmatpush1.bf16.msra.mxu0 %v2256_v25  ;;  %1104 = vmatpush1.bf16.msra.mxu1 %v2258_v26 }
 0x379   :  { %1064 = vmatprep.subr.bf16.mxu0 %v2262_v27  ;;  %1105 = vmatprep.subr.bf16.mxu1 %v2264_v28 }
 0x37c   :  { %1065 = vmatpush1.bf16.msra.mxu0 %v2266_v29  ;;  %1106 = vmatpush1.bf16.msra.mxu1 %v2268_v30 }
 0x37d   :  { %1066 = vmatprep.subr.bf16.mxu0 %v2274_v33  ;;  %1107 = vmatprep.subr.bf16.mxu1 %v2278_v34 }
 0x380   :  { %1067 = vmatpush1.bf16.msra.mxu0 %v2282_v36  ;;  %1108 = vmatpush1.bf16.msra.mxu1 %v2284_v37 }
 0x381   :  { %1068 = vmatprep.subr.bf16.mxu0 %v2288_v38  ;;  %1109 = vmatprep.subr.bf16.mxu1 %v2292_v39 }
 0x384   :  { %1069 = vmatpush1.bf16.msra.mxu0 %v2294_v40  ;;  %1110 = vmatpush1.bf16.msra.mxu1 %v2296_v41 }
 0x385   :  { %1070 = vmatprep.subr.bf16.mxu0 %v2302_v44  ;;  %1111 = vmatprep.subr.bf16.mxu1 %v2306_v45 }
 0x388   :  { %1071 = vmatpush1.bf16.msra.mxu0 %v2315_v47  ;;  %1112 = vmatpush1.bf16.msra.mxu1 %v2317_v48 }
 0x389   :  { %1072 = vmatprep.subr.bf16.mxu0 %v2320_v50  ;;  %1113 = vmatprep.subr.bf16.mxu1 %v2322_v51 }
 0x38c   :  { %1073 = vmatpush1.bf16.msra.mxu0 %v2330_v53  ;;  %1114 = vmatpush1.bf16.msra.mxu1 %v2336_v54 }
 0x38d   :  { %1182 = vmatprep.subr.bf16.mxu0 %v2224_v11  ;;  %1223 = vmatprep.subr.bf16.mxu1 %v2226_v13 }
 0x442   :  { %v968_v14 = vpop.f32.mrb[28].mxu0  ;;  %v1009_v15 = vpop.f32.mrb[28].mxu1 }
 0x443   :  { %v1016_v17 = vadd.f32 %v968_v14, %v2909_v16  ;;  %v1018_v19 = vadd.f32 %v1009_v15, %v2910_v18  ;;  %v970_v22 = vpop.f32.mrb[29].mxu0  ;;  %v1011_v32 = vpop.f32.mrb[29].mxu1 }
 0x444   :  { %v1017_v31 = vadd.f32 %v970_v22, %v2911_v52  ;;  %v1019_v5 = vadd.f32 %v1011_v32, %v2912_v9  ;;  %v972_v46 = vpop.f32.mrb[30].mxu0  ;;  %v1013_v7 = vpop.f32.mrb[30].mxu1  ;;  %v2633_v52 = vld [vmem:[#allocation10] ss:$16 sps:$4 sm:$0xff]   ;;  %v2642_v9 = vld [vmem:[#allocation10 + $0x2c] ss:$16 sps:$4 sm:$0xff]  }
 0x445   :  { %v1020_v21 = vadd.f32 %v1016_v17, %v2444_v43  ;;  %v973_v12 = vpop.f32.mrb[31].mxu0  ;;  %v1014_v11 = vpop.f32.mrb[31].mxu1  ;;  %v1022_v56 = vadd.f32 %v1018_v19, %v2449_v8  ;;  %v2653_v46 = vld [vmem:[#allocation10 + $0x44] ss:$16 sps:$4 sm:$0xff]  }
 0x446   :  { %v1021_v13 = vadd.f32 %v1017_v31, %v2446_v58  ;;  %v1023_v57 = vadd.f32 %v1019_v5, %v2453_v60  ;;  %v2636_v31 = vld [vmem:[#allocation10 + $0x8] ss:$16 sps:$4 sm:$0xff]  }
 0x447   :  { %v1024_v4 = vmul.f32 0.5, %v1020_v21  ;;  %v2650_v5 = vld [vmem:[#allocation10 + $0x28] ss:$16 sps:$4 sm:$0xff]  }
 0x448   :  { %v1028_v35 = vmul.f32 0.5, %v1021_v13  ;;  %v1033_v63 = vmul.f32 0.5, %v1023_v57 }
 0x449   :  { %1900 = vtanh.f32 %v1024_v4 }
 0x44a   :  { %1902 = vtanh.f32 %v1028_v35 }
 0x44b   :  { %1904 = vtanh.f32 %v1022_v56 }
 0x44c   :  { %1906 = vtanh.f32 %v1033_v63 }
 0x453   :  { %v1901_v1 = vpop.eup %1900 }
 0x454   :  { %v1903_v42 = vpop.eup %1902  ;;  %v1026_v3 = vadd.f32 1.0, %v1901_v1 }
 0x455   :  { %v1030_v55 = vadd.f32 1.0, %v1903_v42  ;;  %v1905_v61 = vpop.eup %1904 }
 0x456   :  { %v1027_v59 = vmul.f32 0.5, %v1026_v3  ;;  %v1907_v15 = vpop.eup %1906  ;;  %v1172_v3 = vpop.permute.xlu0 %1171 }
 0x457   :  { %v1031_v62 = vmul.f32 0.5, %v1030_v55  ;;  %v1035_v16 = vadd.f32 1.0, %v1907_v15  ;;  %vm1173_vm14 = vcmp.eq.s32.totalorder %v1172_v3, 1 }
 0x458   :  { %v1038_v0 = vmul.f32 %v1905_v61, %v1027_v59 }
 0x459   :  { %v1037_v10 = vmul.f32 %v1031_v62, %v2575_v2  ;;  %v1036_v17 = vmul.f32 0.5, %v1035_v16  ;;  %v2714_v16 = vld [vmem:[#allocation10 + $0x40] ss:$16 sps:$4 sm:$0xff]  }
 0x45b   :  { %v1039_v20 = vadd.f32 %v1038_v0, %v1037_v10 }
 0x45d   :  { %1908 = vtanh.f32 %v1039_v20  ;;  %v2626_v14 = vsel %vm1049_vm13, %v1039_v20, %v2575_v2  ;;  %v2639_v2 = vld [vmem:[#allocation10 + $0x24] ss:$16 sps:$4 sm:$0xff]  }
 0x467   :  { %v1909_v18 = vpop.eup %1908 }
 0x468   :  { %v1041_v19 = vmul.f32 %v1909_v18, %v1036_v17  ;;  %v2717_v17 = vld [vmem:[#allocation10 + $0x48] ss:$16 sps:$4 sm:$0xff]   ;;  %v2720_v18 = vld [vmem:[#allocation10 + $0x64] ss:$16 sps:$4 sm:$0xff]  }
 0x46a   :  { %v2629_v22 = vsel %vm1049_vm13, %v1041_v19, %v2578_v6  ;;  %v2647_v6 = vld [vmem:[#allocation10 + $0x20] ss:$16 sps:$4 sm:$0xff]   ;;  %v2723_v19 = vld [vmem:[#allocation10 + $0x6c] ss:$16 sps:$4 sm:$0xff]  }
 0x46b   :  { %v1057_v32 = vpack.c.bf16 %v2629_v22, %v2629_v22 }
 0x46d   :  { %1091 = vmatmul.mubr.bf16.vlgmr.msra.gmra.mrb[32].mxu0 %v1057_v32  ;;  %1132 = vmatmul.mubr.bf16.vlgmr.msra.gmra.mrb[32].mxu1 %v1057_v32  ;;  %v2729_v32 = vld [vmem:[#allocation10 + $0x68] ss:$16 sps:$4 sm:$0xff]  }
 0x46e   :  { %1183 = vmatpush1.bf16.msra.mxu0 %v2633_v52  ;;  %1224 = vmatpush1.bf16.msra.mxu1 %v2636_v31 }
 0x46f   :  { %1184 = vmatprep.subr.bf16.mxu0 %v2639_v2  ;;  %1225 = vmatprep.subr.bf16.mxu1 %v2642_v9 }
 0x470   :  { %1214 = vmatprep.mubr.bf16.mxu0 %v2904_v49  ;;  %1255 = vmatprep.mubr.bf16.mxu1 %v2904_v49 }
 0x472   :  { %1185 = vmatpush1.bf16.msra.mxu0 %v2647_v6  ;;  %1226 = vmatpush1.bf16.msra.mxu1 %v2650_v5 }
 0x473   :  { %1186 = vmatprep.subr.bf16.mxu0 %v2653_v46  ;;  %1227 = vmatprep.subr.bf16.mxu1 %v2250_v23  ;;  %v2679_v23 = vld [vmem:[#allocation10 + $0x4] ss:$16 sps:$4 sm:$0xff]  }
 0x476   :  { %1187 = vmatpush1.bf16.msra.mxu0 %v2256_v25  ;;  %1228 = vmatpush1.bf16.msra.mxu1 %v2258_v26  ;;  %v2682_v25 = vld [vmem:[#allocation10 + $0xc] ss:$16 sps:$4 sm:$0xff]  }
 0x477   :  { %1188 = vmatprep.subr.bf16.mxu0 %v2262_v27  ;;  %1229 = vmatprep.subr.bf16.mxu1 %v2264_v28  ;;  %v2913_v28 = vld [vmem:[#allocation26_spill] sm:$0xff] }
 0x47a   :  { %1189 = vmatpush1.bf16.msra.mxu0 %v2266_v29  ;;  %1230 = vmatpush1.bf16.msra.mxu1 %v2268_v30  ;;  %v2914_v30 = vld [vmem:[#allocation27_spill] sm:$0xff] }
 0x47b   :  { %1190 = vmatprep.subr.bf16.mxu0 %v2274_v33  ;;  %1231 = vmatprep.subr.bf16.mxu1 %v2278_v34 }
 0x47e   :  { %1191 = vmatpush1.bf16.msra.mxu0 %v2282_v36  ;;  %1232 = vmatpush1.bf16.msra.mxu1 %v2284_v37  ;;  %v2915_v37 = vld [vmem:[#allocation28_spill] sm:$0xff] }
 0x47f   :  { %1192 = vmatprep.subr.bf16.mxu0 %v2288_v38  ;;  %1233 = vmatprep.subr.bf16.mxu1 %v2292_v39  ;;  %v2916_v39 = vld [vmem:[#allocation29_spill] sm:$0xff] }
 0x482   :  { %1193 = vmatpush1.bf16.msra.mxu0 %v2294_v40  ;;  %1234 = vmatpush1.bf16.msra.mxu1 %v2296_v41 }
 0x483   :  { %1194 = vmatprep.subr.bf16.mxu0 %v2302_v44  ;;  %1235 = vmatprep.subr.bf16.mxu1 %v2306_v45 }
 0x486   :  { %1195 = vmatpush1.bf16.msra.mxu0 %v2315_v47  ;;  %1236 = vmatpush1.bf16.msra.mxu1 %v2317_v48 }
 0x487   :  { %1196 = vmatprep.subr.bf16.mxu0 %v2320_v50  ;;  %1237 = vmatprep.subr.bf16.mxu1 %v2322_v51 }
 0x48a   :  { %1197 = vmatpush1.bf16.msra.mxu0 %v2330_v53  ;;  %1238 = vmatpush1.bf16.msra.mxu1 %v2336_v54 }
 0x48b   :  { %1306 = vmatprep.subr.bf16.mxu0 %v2679_v23  ;;  %1347 = vmatprep.subr.bf16.mxu1 %v2682_v25 }
 0x540   :  { %v1092_v26 = vpop.f32.mrb[32].mxu0  ;;  %v1133_v27 = vpop.f32.mrb[32].mxu1 }
 0x541   :  { %v1140_v29 = vadd.f32 %v1092_v26, %v2913_v28  ;;  %v1142_v33 = vadd.f32 %v1133_v27, %v2914_v30  ;;  %v1094_v34 = vpop.f32.mrb[33].mxu0  ;;  %v1135_v36 = vpop.f32.mrb[33].mxu1  ;;  %v2732_v26 = vld [vmem:[#allocation10 + $0x84] ss:$16 sps:$4 sm:$0xff]   ;;  %v2735_v27 = vld [vmem:[#allocation10 + $0x8c] ss:$16 sps:$4 sm:$0xff]  }
 0x542   :  { %v1141_v38 = vadd.f32 %v1094_v34, %v2915_v37  ;;  %v1143_v40 = vadd.f32 %v1135_v36, %v2916_v39  ;;  %v1096_v41 = vpop.f32.mrb[34].mxu0  ;;  %v1137_v44 = vpop.f32.mrb[34].mxu1  ;;  %v2738_v28 = vld [vmem:[#allocation10 + $0x80] ss:$16 sps:$4 sm:$0xff]   ;;  %v2744_v30 = vld [vmem:[#allocation10 + $0xa4] ss:$16 sps:$4 sm:$0xff]  }
 0x543   :  { %v1144_v45 = vadd.f32 %v1140_v29, %v2444_v43  ;;  %v1097_v47 = vpop.f32.mrb[35].mxu0  ;;  %v1138_v48 = vpop.f32.mrb[35].mxu1  ;;  %v1146_v7 = vadd.f32 %v1142_v33, %v2449_v8  ;;  %v2741_v29 = vld [vmem:[#allocation10 + $0x88] ss:$16 sps:$4 sm:$0xff]   ;;  %v2747_v33 = vld [vmem:[#allocation10 + $0xac] ss:$16 sps:$4 sm:$0xff]  }
 0x544   :  { %v1145_v50 = vadd.f32 %v1141_v38, %v2446_v58  ;;  %v1147_v21 = vadd.f32 %v1143_v40, %v2453_v60  ;;  %v2750_v34 = vld [vmem:[#allocation10 + $0xa0] ss:$16 sps:$4 sm:$0xff]   ;;  %v2753_v36 = vld [vmem:[#allocation10 + $0xa8] ss:$16 sps:$4 sm:$0xff]   ;;  %v2756_v37 = vld [vmem:[#allocation10 + $0xc4] ss:$16 sps:$4 sm:$0xff]  }
 0x545   :  { %v1148_v51 = vmul.f32 0.5, %v1144_v45  ;;  %v2759_v38 = vld [vmem:[#allocation10 + $0xcc] ss:$16 sps:$4 sm:$0xff]   ;;  %v2762_v39 = vld [vmem:[#allocation10 + $0xc0] ss:$16 sps:$4 sm:$0xff]  }
 0x546   :  { %v1152_v53 = vmul.f32 0.5, %v1145_v50  ;;  %v1157_v12 = vmul.f32 0.5, %v1147_v21  ;;  %v2765_v40 = vld [vmem:[#allocation10 + $0xc8] ss:$16 sps:$4 sm:$0xff]   ;;  %v2768_v41 = vld [vmem:[#allocation10 + $0xe4] ss:$16 sps:$4 sm:$0xff]  }
 0x547   :  { %1910 = vtanh.f32 %v1148_v51  ;;  %v2771_v44 = vld [vmem:[#allocation10 + $0xec] ss:$16 sps:$4 sm:$0xff]   ;;  %v2774_v45 = vld [vmem:[#allocation10 + $0xe0] ss:$16 sps:$4 sm:$0xff]  }
 0x548   :  { %1912 = vtanh.f32 %v1152_v53  ;;  %v2917_v50 = vld [vmem:[#allocation30_spill] sm:$0xff]  ;;  %v2918_v53 = vld [vmem:[#allocation31_spill] sm:$0xff] }
 0x549   :  { %1914 = vtanh.f32 %v1146_v7 }
 0x54a   :  { %1916 = vtanh.f32 %v1157_v12 }
 0x551   :  { %v1911_v11 = vpop.eup %1910 }
 0x552   :  { %v1913_v13 = vpop.eup %1912  ;;  %v1150_v4 = vadd.f32 1.0, %v1911_v11  ;;  %v2919_v11 = vld [vmem:[#allocation32_spill] sm:$0xff] }
 0x553   :  { %v1154_v35 = vadd.f32 1.0, %v1913_v13  ;;  %v1915_v57 = vpop.eup %1914 }
 0x554   :  { %v1151_v56 = vmul.f32 0.5, %v1150_v4  ;;  %v1917_v61 = vpop.eup %1916  ;;  %v2920_v4 = vld [vmem:[#allocation33_spill] sm:$0xff] }
 0x555   :  { %v1155_v63 = vmul.f32 0.5, %v1154_v35  ;;  %v1159_v62 = vadd.f32 1.0, %v1917_v61 }
 0x556   :  { %v1162_v1 = vmul.f32 %v1915_v57, %v1151_v56 }
 0x557   :  { %v1161_v42 = vmul.f32 %v1155_v63, %v2626_v14  ;;  %v1160_v0 = vmul.f32 0.5, %v1159_v62 }
 0x559   :  { %v1163_v55 = vadd.f32 %v1162_v1, %v1161_v42 }
 0x55b   :  { %1918 = vtanh.f32 %v1163_v55  ;;  %v2695_v59 = vsel %vm1173_vm14, %v1163_v55, %v2626_v14  ;;  %v2711_v14 = vld [vmem:[#allocation10 + $0x4c] ss:$16 sps:$4 sm:$0xff]  }
 0x565   :  { %v1919_v10 = vpop.eup %1918 }
 0x566   :  { %v1165_v24 = vmul.f32 %v1919_v10, %v1160_v0 }
 0x568   :  { %v2698_v20 = vsel %vm1173_vm14, %v1165_v24, %v2629_v22  ;;  %v2726_v22 = vld [vmem:[#allocation10 + $0x60] ss:$16 sps:$4 sm:$0xff]  }
 0x569   :  { %v1181_v15 = vpack.c.bf16 %v2698_v20, %v2698_v20 }
 0x56b   :  { %1215 = vmatmul.mubr.bf16.vlgmr.msra.gmra.mrb[36].mxu0 %v1181_v15  ;;  %1256 = vmatmul.mubr.bf16.vlgmr.msra.gmra.mrb[36].mxu1 %v1181_v15 }
 0x56c   :  { %1307 = vmatpush1.bf16.msra.mxu0 %v2633_v52  ;;  %1348 = vmatpush1.bf16.msra.mxu1 %v2636_v31 }
 0x56d   :  { %1308 = vmatprep.subr.bf16.mxu0 %v2639_v2  ;;  %1349 = vmatprep.subr.bf16.mxu1 %v2642_v9 }
 0x56e   :  { %1338 = vmatprep.mubr.bf16.mxu0 %v2904_v49  ;;  %1379 = vmatprep.mubr.bf16.mxu1 %v2904_v49 }
 0x570   :  { %1309 = vmatpush1.bf16.msra.mxu0 %v2647_v6  ;;  %1350 = vmatpush1.bf16.msra.mxu1 %v2650_v5 }
 0x571   :  { %1310 = vmatprep.subr.bf16.mxu0 %v2653_v46  ;;  %1351 = vmatprep.subr.bf16.mxu1 %v2711_v14 }
 0x574   :  { %1311 = vmatpush1.bf16.msra.mxu0 %v2714_v16  ;;  %1352 = vmatpush1.bf16.msra.mxu1 %v2717_v17 }
 0x575   :  { %1312 = vmatprep.subr.bf16.mxu0 %v2720_v18  ;;  %1353 = vmatprep.subr.bf16.mxu1 %v2723_v19 }
 0x578   :  { %1313 = vmatpush1.bf16.msra.mxu0 %v2726_v22  ;;  %1354 = vmatpush1.bf16.msra.mxu1 %v2729_v32 }
 0x579   :  { %1314 = vmatprep.subr.bf16.mxu0 %v2732_v26  ;;  %1355 = vmatprep.subr.bf16.mxu1 %v2735_v27 }
 0x57c   :  { %1315 = vmatpush1.bf16.msra.mxu0 %v2738_v28  ;;  %1356 = vmatpush1.bf16.msra.mxu1 %v2741_v29 }
 0x57d   :  { %1316 = vmatprep.subr.bf16.mxu0 %v2744_v30  ;;  %1357 = vmatprep.subr.bf16.mxu1 %v2747_v33 }
 0x580   :  { %1317 = vmatpush1.bf16.msra.mxu0 %v2750_v34  ;;  %1358 = vmatpush1.bf16.msra.mxu1 %v2753_v36 }
 0x581   :  { %1318 = vmatprep.subr.bf16.mxu0 %v2756_v37  ;;  %1359 = vmatprep.subr.bf16.mxu1 %v2759_v38 }
 0x584   :  { %1319 = vmatpush1.bf16.msra.mxu0 %v2762_v39  ;;  %1360 = vmatpush1.bf16.msra.mxu1 %v2765_v40 }
 0x585   :  { %1320 = vmatprep.subr.bf16.mxu0 %v2768_v41  ;;  %1361 = vmatprep.subr.bf16.mxu1 %v2771_v44 }
 0x588   :  { %1321 = vmatpush1.bf16.msra.mxu0 %v2774_v45  ;;  %1362 = vmatpush1.bf16.msra.mxu1 %v2336_v54 }
 0x589   :  { %1430 = vmatprep.subr.bf16.mxu0 %v2679_v23  ;;  %1471 = vmatprep.subr.bf16.mxu1 %v2682_v25 }
 0x63e   :  { %v1216_v47 = vpop.f32.mrb[36].mxu0  ;;  %v1257_v48 = vpop.f32.mrb[36].mxu1 }
 0x63f   :  { %v1264_v51 = vadd.f32 %v1216_v47, %v2917_v50  ;;  %v1266_v7 = vadd.f32 %v1257_v48, %v2918_v53  ;;  %v1218_v21 = vpop.f32.mrb[37].mxu0  ;;  %v1259_v12 = vpop.f32.mrb[37].mxu1 }
 0x640   :  { %v1265_v13 = vadd.f32 %v1218_v21, %v2919_v11  ;;  %v1267_v35 = vadd.f32 %v1259_v12, %v2920_v4  ;;  %v1220_v56 = vpop.f32.mrb[38].mxu0  ;;  %v1261_v57 = vpop.f32.mrb[38].mxu1 }
 0x641   :  { %v1268_v54 = vadd.f32 %v1264_v51, %v2444_v43  ;;  %v1221_v63 = vpop.f32.mrb[39].mxu0  ;;  %v1262_v23 = vpop.f32.mrb[39].mxu1  ;;  %v1270_v3 = vadd.f32 %v1266_v7, %v2449_v8 }
 0x642   :  { %v1269_v25 = vadd.f32 %v1265_v13, %v2446_v58  ;;  %v1271_v55 = vadd.f32 %v1267_v35, %v2453_v60  ;;  %v1296_v53 = vpop.permute.xlu1 %1295 }
 0x643   :  { %v1272_v1 = vmul.f32 0.5, %v1268_v54  ;;  %vm1297_vm15 = vcmp.eq.s32.totalorder %v1296_v53, 1  ;;  %v1420_v54 = vpop.permute.xlu0 %1419  ;;  %v1868_v53 = vld [vmem:[#allocation11 + $0x30] sm:$0xff]  }
 0x644   :  { %v1276_v42 = vmul.f32 0.5, %v1269_v25  ;;  %v1281_v61 = vmul.f32 0.5, %v1271_v55  ;;  %vm1421_vm0 = vcmp.eq.s32.totalorder %v1420_v54, 1 }
 0x645   :  { %1920 = vtanh.f32 %v1272_v1 }
 0x646   :  { %1922 = vtanh.f32 %v1276_v42 }
 0x647   :  { %1924 = vtanh.f32 %v1270_v3 }
 0x648   :  { %1926 = vtanh.f32 %v1281_v61 }
 0x64f   :  { %v1921_v62 = vpop.eup %1920 }
 0x650   :  { %v1923_v0 = vpop.eup %1922  ;;  %v1274_v10 = vadd.f32 1.0, %v1921_v62 }
 0x651   :  { %v1278_v24 = vadd.f32 1.0, %v1923_v0  ;;  %v1925_v47 = vpop.eup %1924 }
 0x652   :  { %v1275_v15 = vmul.f32 0.5, %v1274_v10  ;;  %v1927_v12 = vpop.eup %1926  ;;  %v1862_v10 = vld [vmem:[#allocation11] sm:$0xff]  }
 0x653   :  { %v1279_v48 = vmul.f32 0.5, %v1278_v24  ;;  %v1283_v11 = vadd.f32 1.0, %v1927_v12  ;;  %v2116_v24 = vmov 0.0  }
 0x654   :  { %v1286_v50 = vmul.f32 %v1925_v47, %v1275_v15  ;;  %v1863_v15 = vld [vmem:[#allocation11 + $0x8] sm:$0xff]   ;;  %v1864_v47 = vld [vmem:[#allocation11 + $0x10] sm:$0xff]  }
 0x655   :  { %v1285_v51 = vmul.f32 %v1279_v48, %v2695_v59  ;;  %v1284_v13 = vmul.f32 0.5, %v1283_v11  ;;  %v1865_v48 = vld [vmem:[#allocation11 + $0x18] sm:$0xff]   ;;  %v2925_v11 = vld [vmem:[#allocation38_spill] sm:$0xff] }
 0x657   :  { %v1287_v21 = vadd.f32 %v1286_v50, %v1285_v51  ;;  %v1866_v50 = vld [vmem:[#allocation11 + $0x20] sm:$0xff]   ;;  %v1867_v51 = vld [vmem:[#allocation11 + $0x28] sm:$0xff]  }
 0x659   :  { %1928 = vtanh.f32 %v1287_v21  ;;  %v2790_v7 = vsel %vm1297_vm15, %v1287_v21, %v2695_v59  ;;  %v1869_v21 = vld [vmem:[#allocation11 + $0x38] sm:$0xff]  }
 0x663   :  { %v1929_v4 = vpop.eup %1928 }
 0x664   :  { %v1289_v35 = vmul.f32 %v1929_v4, %v1284_v13  ;;  %v2926_v4 = vld [vmem:[#allocation39_spill] sm:$0xff] }
 0x666   :  { %v2793_v56 = vsel %vm1297_vm15, %v1289_v35, %v2698_v20  ;;  %v2923_v20 = vld [vmem:[#allocation36_spill] sm:$0xff] }
 0x667   :  { %v1305_v57 = vpack.c.bf16 %v2793_v56, %v2793_v56 }
 0x669   :  { %1339 = vmatmul.mubr.bf16.vlgmr.msra.gmra.mrb[40].mxu0 %v1305_v57  ;;  %1380 = vmatmul.mubr.bf16.vlgmr.msra.gmra.mrb[40].mxu1 %v1305_v57 }
 0x66a   :  { %1431 = vmatpush1.bf16.msra.mxu0 %v2633_v52  ;;  %1472 = vmatpush1.bf16.msra.mxu1 %v2636_v31 }
 0x66b   :  { %1432 = vmatprep.subr.bf16.mxu0 %v2639_v2  ;;  %1473 = vmatprep.subr.bf16.mxu1 %v2642_v9  ;;  %v2921_v2 = vld [vmem:[#allocation34_spill] sm:$0xff] }
 0x66c   :  { %1462 = vmatprep.mubr.bf16.mxu0 %v2904_v49  ;;  %1503 = vmatprep.mubr.bf16.mxu1 %v2904_v49  ;;  %v1985_v49 = vld [vmem:[#allocation10 + $0xe8] ss:$16 sps:$4 sm:$0xff]  }
 0x66e   :  { %1433 = vmatpush1.bf16.msra.mxu0 %v2647_v6  ;;  %1474 = vmatpush1.bf16.msra.mxu1 %v2650_v5  ;;  %v2922_v6 = vld [vmem:[#allocation35_spill] sm:$0xff] }
 0x66f   :  { %1434 = vmatprep.subr.bf16.mxu0 %v2653_v46  ;;  %1475 = vmatprep.subr.bf16.mxu1 %v2711_v14 }
 0x672   :  { %1435 = vmatpush1.bf16.msra.mxu0 %v2714_v16  ;;  %1476 = vmatpush1.bf16.msra.mxu1 %v2717_v17  ;;  %v2924_v16 = vld [vmem:[#allocation37_spill] sm:$0xff] }
 0x673   :  { %1436 = vmatprep.subr.bf16.mxu0 %v2720_v18  ;;  %1477 = vmatprep.subr.bf16.mxu1 %v2723_v19 }
 0x676   :  { %1437 = vmatpush1.bf16.msra.mxu0 %v2726_v22  ;;  %1478 = vmatpush1.bf16.msra.mxu1 %v2729_v32 }
 0x677   :  { %1438 = vmatprep.subr.bf16.mxu0 %v2732_v26  ;;  %1479 = vmatprep.subr.bf16.mxu1 %v2735_v27 }
 0x67a   :  { %1439 = vmatpush1.bf16.msra.mxu0 %v2738_v28  ;;  %1480 = vmatpush1.bf16.msra.mxu1 %v2741_v29 }
 0x67b   :  { %1440 = vmatprep.subr.bf16.mxu0 %v2744_v30  ;;  %1481 = vmatprep.subr.bf16.mxu1 %v2747_v33 }
 0x67e   :  { %1441 = vmatpush1.bf16.msra.mxu0 %v2750_v34  ;;  %1482 = vmatpush1.bf16.msra.mxu1 %v2753_v36 }
 0x67f   :  { %1442 = vmatprep.subr.bf16.mxu0 %v2756_v37  ;;  %1483 = vmatprep.subr.bf16.mxu1 %v2759_v38 }
 0x682   :  { %1443 = vmatpush1.bf16.msra.mxu0 %v2762_v39  ;;  %1484 = vmatpush1.bf16.msra.mxu1 %v2765_v40 }
 0x683   :  { %1444 = vmatprep.subr.bf16.mxu0 %v2768_v41  ;;  %1485 = vmatprep.subr.bf16.mxu1 %v2771_v44 }
 0x686   :  { %1445 = vmatpush1.bf16.msra.mxu0 %v2774_v45  ;;  %1486 = vmatpush1.bf16.msra.mxu1 %v1985_v49  ;;  %v2927_v49 = vld [vmem:[#allocation40_spill] sm:$0xff] }
 0x687   :  { %1765 = vmatprep.subr.bf16.mxu0 %v2116_v24 }
 0x73c   :  { %v1340_v52 = vpop.f32.mrb[40].mxu0  ;;  %v1381_v31 = vpop.f32.mrb[40].mxu1 }
 0x73d   :  { %v1388_v9 = vadd.f32 %v1340_v52, %v2921_v2  ;;  %v1390_v5 = vadd.f32 %v1381_v31, %v2922_v6  ;;  %v1342_v46 = vpop.f32.mrb[41].mxu0  ;;  %v1383_v59 = vpop.f32.mrb[41].mxu1  ;;  %v2928_v31 = vld [vmem:[#allocation41_spill] sm:$0xff] }
 0x73e   :  { %v1389_v14 = vadd.f32 %v1342_v46, %v2923_v20  ;;  %v1391_v17 = vadd.f32 %v1383_v59, %v2924_v16  ;;  %v1344_v18 = vpop.f32.mrb[42].mxu0  ;;  %v1385_v19 = vpop.f32.mrb[42].mxu1 }
 0x73f   :  { %v1392_v22 = vadd.f32 %v1388_v9, %v2444_v43  ;;  %v1345_v32 = vpop.f32.mrb[43].mxu0  ;;  %v1386_v26 = vpop.f32.mrb[43].mxu1  ;;  %v1394_v30 = vadd.f32 %v1390_v5, %v2449_v8 }
 0x740   :  { %v1393_v27 = vadd.f32 %v1389_v14, %v2446_v58  ;;  %v1395_v33 = vadd.f32 %v1391_v17, %v2453_v60 }
 0x741   :  { %v1396_v28 = vmul.f32 0.5, %v1392_v22 }
 0x742   :  { %v1400_v29 = vmul.f32 0.5, %v1393_v27  ;;  %v1405_v34 = vmul.f32 0.5, %v1395_v33 }
 0x743   :  { %1930 = vtanh.f32 %v1396_v28 }
 0x744   :  { %1932 = vtanh.f32 %v1400_v29 }
 0x745   :  { %1934 = vtanh.f32 %v1394_v30 }
 0x746   :  { %1936 = vtanh.f32 %v1405_v34 }
 0x74d   :  { %v1931_v36 = vpop.eup %1930 }
 0x74e   :  { %v1933_v37 = vpop.eup %1932  ;;  %v1398_v38 = vadd.f32 1.0, %v1931_v36  ;;  %v1544_v36 = vpop.permute.xlu1 %1543 }
 0x74f   :  { %v1402_v39 = vadd.f32 1.0, %v1933_v37  ;;  %v1935_v41 = vpop.eup %1934  ;;  %vm1545_vm2 = vcmp.eq.s32.totalorder %v1544_v36, 1 }
 0x750   :  { %v1399_v40 = vmul.f32 0.5, %v1398_v38  ;;  %v1937_v1 = vpop.eup %1936 }
 0x751   :  { %v1403_v44 = vmul.f32 0.5, %v1402_v39  ;;  %v1407_v42 = vadd.f32 1.0, %v1937_v1 }
 0x752   :  { %v1410_v45 = vmul.f32 %v1935_v41, %v1399_v40  ;;  %v1741_v41 = vld [vmem:[%s2876_s6] ss:$0 sm:$0xff]  ;;  %s2074_s6 = scalar_lea.vmem %s1683_s9, 128 }
 0x753   :  { %v1409_v63 = vmul.f32 %v1403_v44, %v2790_v7  ;;  %v1408_v3 = vmul.f32 0.5, %v1407_v42  ;;  %p2075_p4 = scmp.ne.s32.totalorder %s1683_s9, %s2074_s6  ;;  %p2080_p6 = scmp.lt.s32.totalorder %s2074_s6, %s2074_s6 }
 0x755   :  { %v1411_v23 = vadd.f32 %v1410_v45, %v1409_v63  ;;  %p2081_p7 = por %p2080_p6, %p2079_p5 }
 0x757   :  { %1938 = vtanh.f32 %v1411_v23  ;;  %v2838_v25 = vsel %vm1421_vm0, %v1411_v23, %v2790_v7  ;;  %p2082_p8 = pnand %p2081_p7, %p2075_p4 }
 0x761   :  { %v1939_v55 = vpop.eup %1938 }
 0x762   :  { %v1413_v61 = vmul.f32 %v1939_v55, %v1408_v3 }
 0x764   :  { %v2841_v62 = vsel %vm1421_vm0, %v1413_v61, %v2793_v56 }
 0x765   :  { %v1429_v0 = vpack.c.bf16 %v2841_v62, %v2841_v62 }
 0x767   :  { %1463 = vmatmul.mubr.bf16.vlgmr.msra.gmra.mrb[44].mxu0 %v1429_v0  ;;  %1504 = vmatmul.mubr.bf16.vlgmr.msra.gmra.mrb[44].mxu1 %v1429_v0 }
 0x768   :  { %1766 = vmatpush3.bf16.msra.mxu0 %v1862_v10  ;;  %1781 = vmatprep.mubr.msk.bf16.mxu0 %vm2117_vm1, %v2116_v24 }
 0x769   :  { %1767 = vmatprep.subr.bf16.mxu0 %v2116_v24 }
 0x76c   :  { %1768 = vmatpush3.bf16.msra.mxu0 %v1863_v15 }
 0x76d   :  { %1769 = vmatprep.subr.bf16.mxu0 %v2116_v24 }
 0x770   :  { %1770 = vmatpush3.bf16.msra.mxu0 %v1864_v47 }
 0x771   :  { %1771 = vmatprep.subr.bf16.mxu0 %v2116_v24 }
 0x774   :  { %1772 = vmatpush3.bf16.msra.mxu0 %v1865_v48 }
 0x775   :  { %1773 = vmatprep.subr.bf16.mxu0 %v2116_v24 }
 0x778   :  { %1774 = vmatpush3.bf16.msra.mxu0 %v1866_v50 }
 0x779   :  { %1775 = vmatprep.subr.bf16.mxu0 %v2116_v24 }
 0x77c   :  { %1776 = vmatpush3.bf16.msra.mxu0 %v1867_v51 }
 0x77d   :  { %1777 = vmatprep.subr.bf16.mxu0 %v2116_v24 }
 0x780   :  { %1778 = vmatpush3.bf16.msra.mxu0 %v1868_v53 }
 0x781   :  { %1779 = vmatprep.subr.bf16.mxu0 %v2116_v24 }
 0x784   :  { %1780 = vmatpush3.bf16.msra.mxu0 %v1869_v21 }
 0x83a   :  { %v1464_v7 = vpop.f32.mrb[44].mxu0  ;;  %v1505_v12 = vpop.f32.mrb[44].mxu1 }
 0x83b   :  { %v1512_v13 = vadd.f32 %v1464_v7, %v2925_v11  ;;  %v1514_v35 = vadd.f32 %v1505_v12, %v2926_v4  ;;  %v1466_v56 = vpop.f32.mrb[45].mxu0  ;;  %v1507_v57 = vpop.f32.mrb[45].mxu1 }
 0x83c   :  { %v1513_v52 = vadd.f32 %v1466_v56, %v2927_v49  ;;  %v1515_v2 = vadd.f32 %v1507_v57, %v2928_v31  ;;  %v1468_v9 = vpop.f32.mrb[46].mxu0  ;;  %v1509_v6 = vpop.f32.mrb[46].mxu1 }
 0x83d   :  { %v1516_v5 = vadd.f32 %v1512_v13, %v2444_v43  ;;  %v1469_v46 = vpop.f32.mrb[47].mxu0  ;;  %v1510_v59 = vpop.f32.mrb[47].mxu1  ;;  %v1518_v17 = vadd.f32 %v1514_v35, %v2449_v8 }
 0x83e   :  { %v1517_v20 = vadd.f32 %v1513_v52, %v2446_v58  ;;  %v1519_v18 = vadd.f32 %v1515_v2, %v2453_v60 }
 0x83f   :  { %v1520_v14 = vmul.f32 0.5, %v1516_v5 }
 0x840   :  { %v1524_v16 = vmul.f32 0.5, %v1517_v20  ;;  %v1529_v19 = vmul.f32 0.5, %v1519_v18 }
 0x841   :  { %1940 = vtanh.f32 %v1520_v14 }
 0x842   :  { %1942 = vtanh.f32 %v1524_v16 }
 0x843   :  { %1944 = vtanh.f32 %v1518_v17 }
 0x844   :  { %1946 = vtanh.f32 %v1529_v19 }
 0x84b   :  { %v1941_v22 = vpop.eup %1940 }
 0x84c   :  { %v1943_v32 = vpop.eup %1942  ;;  %v1522_v26 = vadd.f32 1.0, %v1941_v22 }
 0x84d   :  { %v1526_v27 = vadd.f32 1.0, %v1943_v32  ;;  %v1945_v28 = vpop.eup %1944 }
 0x84e   :  { %v1523_v43 = vmul.f32 0.5, %v1522_v26  ;;  %v1947_v34 = vpop.eup %1946 }
 0x84f   :  { %v1527_v29 = vmul.f32 0.5, %v1526_v27  ;;  %v1531_v8 = vadd.f32 1.0, %v1947_v34 }
 0x850   :  { %v1534_v30 = vmul.f32 %v1945_v28, %v1523_v43 }
 0x851   :  { %v1533_v58 = vmul.f32 %v1527_v29, %v2838_v25  ;;  %v1532_v37 = vmul.f32 0.5, %v1531_v8 }
 0x853   :  { %v1535_v33 = vadd.f32 %v1534_v30, %v1533_v58 }
 0x855   :  { %1948 = vtanh.f32 %v1535_v33 }
 0x85f   :  { %v1949_v38 = vpop.eup %1948 }
 0x860   :  { %v1537_v60 = vmul.f32 %v1949_v38, %v1532_v37 }
 0x862   :  { %v1546_v39 = vsel %vm1545_vm2, %v1537_v60, %v2841_v62 }
 0x863   :  { %v1553_v40 = vpack.c.bf16 %v1546_v39, %v1546_v39 }
 0x865   :  { %1782 = vmatmul.mubr.bf16.vlgmr.msra.gmra.mrb[48].mxu0 %v1553_v40 }
 0x938   :  { %v1659_v44 = vpop.f32.mrb[48].mxu0 }
 0x939   :  { %v1660_v45 = vadd.f32 %v1741_v41, %v1659_v44  ;;  %v1783_v54 = vpop.f32.mrb[49].mxu0 }
 0x93a   :  { %v1662_v63 = vpop.f32.mrb[50].mxu0 }
 0x93b   :  { %1665 = vmax.xlane.f32.xlu0 %v1660_v45  ;;  %v1784_v23 = vpop.f32.mrb[51].mxu0 }
 0x9c8   :  { %v1666_v25 = vpop.xlane.xlu0 %1665 }
 0x9c9   :  { %v1667_v1 = vsub.f32 %v1660_v45, %v1666_v25 }
 0x9cb   :  { %v1668_v42 = vmul.f32 1.442695, %v1667_v1 }
 0x9cd   :  { %1950 = vpow2.f32 %v1668_v42 }
 0x9d7   :  { %v1951_v3 = vpop.eup %1950 }
 0x9d8   :  { %1670 = vadd.xlane.f32.xlu1 %v1951_v3 }
 0xa65   :  { %v1671_v55 = vpop.xlane.xlu1 %1670 }
 0xa66   :  { %1952 = vlog2.f32 %v1671_v55 }
 0xa70   :  { %v1953_v61 = vpop.eup %1952 }
 0xa71   :  { %v1673_v62 = vmul.f32 0.6931472, %v1953_v61 }
 0xa73   :  { %v1674_v0 = vsub.f32 %v1667_v1, %v1673_v62 }
 0xa75   :  { %1675 = vst [vmem:[#allocation13] sm:$0xff] %v1674_v0 }
 0xa76   :  { %2085 = shalt.err (!%p2082_p8)
}
 0xa77   :  { %s2086_s14 = scalar_lea.hbm %s2877_s7, 128 }
 0xa78   :  { %p2087_p9 = scmp.ne.s32.totalorder %s2877_s7, %s2086_s14  ;;  %p2090_p10 = scmp.lt.u32.totalorder %s2086_s14, %s2877_s7 }
 0xa7a   :  { %p2092_p11 = pnand %p2090_p10, %p2087_p9 }
 0xa7c   :  { %2095 = shalt.err (!%p2092_p11)
}
 0xa7d   :  { %1685 = dma.vmem_to_hbm [thread:$0]  %s1683_s9, 128, %s2877_s7, [#allocation7]  }
 0xa7e   :  { %2102 = dma.done.wait [#allocation7], 128  }
 0xa7f   :  { %2103 = vsyncadd [#allocation7], 4294967168 }
 0xa80   :  { %1689 = vsyncpa [#allocation6], 1 }
 0xa81   :  { %1690 = vsyncpa [#allocation9], 1 }
 0xa82   :  { %1691 = vsyncpa [#allocation12], 1 }
 0xa83   :  { %1692 = vsyncpa [#allocation7], 1 }

</bundles_post_ra>
